<compile_context>
chip_gen: v5e
topology: v5e:2x2
jax: 0.10.0
libtpu: 0.0.40
codegen_flags: <defaults>
</compile_context>

<pallas_src>
import functools

import jax
import jax.numpy as jnp
import numpy as np
from jax.experimental import pallas as pl
from jax.experimental.pallas import tpu as pltpu


def _if_neuron_kernel(x_ref, w_ref, b_ref, out_ref, mem_ref, acts_ref,
                      *, vth: float, tt: int, batch: int, total_t: int):
    tb = pl.program_id(1)            # time-block index (sequential recurrence axis)
    n_tb = pl.num_programs(1)

    # (Re-)initialize state at the first time block of every output tile.
    @pl.when(tb == 0)
    def _():
        mem_ref[...] = jnp.zeros_like(mem_ref)    # mem_pot_init = 0
        out_ref[...] = jnp.zeros_like(out_ref)    # spike-count accumulator

    # fwd_func = F.linear for all `tt` timesteps at once:
    #   (tt*B, D_in) @ (D_in, tile_N) -> f32 accumulation, bias added in f32.
    acts_ref[...] = (
        jnp.dot(x_ref[...], w_ref[...], preferred_element_type=jnp.float32)
        + b_ref[...]
    )

    # IF-neuron recurrence over the tt timesteps (VPU, fully unrolled, static slices).
    mem = mem_ref[...]
    spikes = out_ref[...]
    for i in range(tt):
        x_t = acts_ref[i * batch:(i + 1) * batch, :]
        fired = mem > vth                        # previous step's spike (recomputed)
        mem = jnp.where(fired, x_t, mem + x_t)   # == mem * (1 - spike) + x
        spikes = spikes + (mem > vth).astype(jnp.float32)
    mem_ref[...] = mem

    # Rate-coded output: apply Vth/T scaling only on the last time block.
    scale = jnp.where(tb == n_tb - 1, jnp.float32(vth / total_t), jnp.float32(1.0))
    out_ref[...] = spikes * scale


def _pick_time_block(n_t, batch, row_align, target_rows=256, max_rows=1024):
    """Divisor TT of n_t so the matmul gets >= target_rows rows (MXU fill)."""
    cands = [tt for tt in range(1, n_t + 1)
             if n_t % tt == 0 and tt * batch <= max_rows
             and ((tt * batch) % row_align == 0 or tt == n_t)]
    if not cands:
        return n_t
    for tt in cands:
        if tt * batch >= target_rows:
            return tt
    return cands[-1]


def _pick_out_tile(d_out, cap=256):
    """Largest multiple of 128 that divides d_out and is <= cap (else full)."""
    if d_out % 128 != 0:
        return d_out
    tile = 128
    for cand in range(128, min(d_out, cap) + 1, 128):
        if d_out % cand == 0:
            tile = cand
    return tile


def if_neuron(cur_inp, weight, bias, *, vth=1.0, compute_dtype=jnp.bfloat16):
    """IFNeuron forward, fwd_func = F.linear.

    cur_inp: [T, B, D_in] f32;  weight: [D_out, D_in];  bias: [D_out].
    Returns spikes * Vth / T with shape [B, D_out] (f32).
    """
    n_t, batch, d_in = cur_inp.shape
    d_out = weight.shape[0]

    # Wrapper-side glue (cheap XLA ops): flatten time into rows so a whole block of
    # timesteps goes through one matmul, pre-transpose W, cast matmul operands.
    x2d = cur_inp.reshape(n_t * batch, d_in).astype(compute_dtype)
    w_t = weight.T.astype(compute_dtype)              # [D_in, D_out]
    b2 = bias.reshape(1, d_out).astype(jnp.float32)

    row_align = 16 if jnp.dtype(compute_dtype).itemsize < 4 else 8
    tt = _pick_time_block(n_t, batch, row_align)      # timesteps per grid step
    tile_n = _pick_out_tile(d_out)                    # output-feature tile
    n_tb = n_t // tt
    n_tiles = d_out // tile_n

    kernel = functools.partial(_if_neuron_kernel, vth=float(vth), tt=tt,
                               batch=batch, total_t=n_t)

    return pl.pallas_call(
        kernel,
        out_shape=jax.ShapeDtypeStruct((batch, d_out), jnp.float32),
        grid_spec=pltpu.PrefetchScalarGridSpec(
            num_scalar_prefetch=0,
            grid=(n_tiles, n_tb),                     # (D_out tiles, time blocks)
            in_specs=[
                pl.BlockSpec((tt * batch, d_in), lambda n, t: (t, 0)),   # x rows for TT steps
                pl.BlockSpec((d_in, tile_n), lambda n, t: (0, n)),       # W^T tile (resident over time)
                pl.BlockSpec((1, tile_n), lambda n, t: (0, n)),          # bias tile
            ],
            out_specs=pl.BlockSpec((batch, tile_n), lambda n, t: (0, n)),  # resident accumulator
            scratch_shapes=[
                pltpu.VMEM((batch, tile_n), jnp.float32),        # mem (persistent state)
                pltpu.VMEM((tt * batch, tile_n), jnp.float32),   # activations for TT steps
            ],
        ),
        compiler_params=pltpu.CompilerParams(
            dimension_semantics=("parallel", "arbitrary"),   # time axis is sequential
            vmem_limit_bytes=64 * 1024 * 1024,
        ),
    )(x2d, w_t, b2)


def if_neuron_ref(cur_inp, weight, bias, *, vth=1.0):
    """Pure-JAX reference mirroring the PyTorch forward (f32)."""
    n_t = cur_inp.shape[0]
    out0 = cur_inp[0] @ weight.T + bias
    mem = jnp.zeros_like(out0)       # mem_pot_init
    spike = jnp.zeros_like(out0)
    spikes = jnp.zeros_like(out0)
    for t in range(n_t):
        x = cur_inp[t] @ weight.T + bias
        mem = mem * (1.0 - spike) + x
        spike = (mem > vth).astype(jnp.float32)
        spikes = spikes + spike
    return spikes * vth / n_t


if __name__ == "__main__":
    # Small but tiling-exercising shapes: grid = (2 D_out tiles, 2 time blocks).
    T, B, D_in, D_out = 32, 16, 128, 512
    Vth = 1.0

    key = jax.random.PRNGKey(0)
    k_x, k_w, k_b = jax.random.split(key, 3)
    cur_inp = jax.random.normal(k_x, (T, B, D_in), dtype=jnp.float32)
    weight = jax.random.normal(k_w, (D_out, D_in), dtype=jnp.float32) * 0.05
    bias = jax.random.normal(k_b, (D_out,), dtype=jnp.float32) * 0.1

    ref = np.asarray(if_neuron_ref(cur_inp, weight, bias, vth=Vth))

    # 1) f32 matmul path: must reproduce the PyTorch-style reference.
    #    Outputs are quantized to multiples of Vth/T, so a rounding difference exactly
    #    at the threshold flips a whole quantum; require (near-)exact agreement on
    #    essentially every element instead of a blanket tight allclose.
    out_f32 = jax.block_until_ready(
        if_neuron(cur_inp, weight, bias, vth=Vth, compute_dtype=jnp.float32))
    diff = np.abs(np.asarray(out_f32) - ref)
    exact_frac = float(np.mean(diff <= 1e-5))
    assert exact_frac >= 0.999, f"f32 path mismatch fraction {1.0 - exact_frac}"
    assert float(np.mean(diff)) < 5e-3

    # 2) bf16 matmul path (default, MXU-native): rate-level sanity check only, since
    #    near-threshold membrane values may legitimately flip a spike under bf16.
    out_bf16 = jax.block_until_ready(if_neuron(cur_inp, weight, bias, vth=Vth))
    assert out_bf16.shape == ref.shape
    assert bool(jnp.all(jnp.isfinite(out_bf16)))
    assert float(np.mean(np.abs(np.asarray(out_bf16) - ref))) < 0.1

    print("KERNEL_OK")
</pallas_src>

<mosaic_0001>
module attributes {stable_mosaic.version = 11 : i64} {
  func.func @_if_neuron_kernel(%arg0: i32, %arg1: i32, %arg2: memref<256x128xf32, #tpu.memory_space<vmem>>, %arg3: memref<128x256xf32, #tpu.memory_space<vmem>>, %arg4: memref<1x256xf32, #tpu.memory_space<vmem>>, %arg5: memref<16x256xf32, #tpu.memory_space<vmem>>, %arg6: memref<16x256xf32, #tpu.memory_space<vmem>>, %arg7: memref<256x256xf32, #tpu.memory_space<vmem>>) attributes {dimension_semantics = [#tpu.dimension_semantics<parallel>, #tpu.dimension_semantics<arbitrary>], iteration_bounds = array<i64: 2, 2>, scalar_prefetch = 0 : i64, scratch_operands = 2 : i64, tpu.core_type = #tpu.core_type<tc>, window_params = [{transform_indices = @transform_0, window_bounds = array<i64: 256, 128>}, {transform_indices = @transform_1, window_bounds = array<i64: 128, 256>}, {transform_indices = @transform_2, window_bounds = array<i64: 1, 256>}, {transform_indices = @transform_3, window_bounds = array<i64: 16, 256>}]} {
    %c0_i32 = arith.constant 0 : i32
    %0 = arith.cmpi eq, %arg1, %c0_i32 : i32
    %1 = arith.extui %0 : i1 to i32
    %c0_i32_0 = arith.constant 0 : i32
    %2 = arith.cmpi ne, %1, %c0_i32_0 : i32
    scf.if %2 {
      %cst_67 = arith.constant 0.000000e+00 : f32
      %178 = vector.broadcast %cst_67 : f32 to vector<16x256xf32>
      %c0_68 = arith.constant 0 : index
      %c0_69 = arith.constant 0 : index
      %179 = vector.load %arg6[%c0_68, %c0_69] : memref<16x256xf32, #tpu.memory_space<vmem>>, vector<16x256xf32>
      tpu.vector_store %arg6[%c0_68, %c0_69], %178 {strides = array<i32>} : memref<16x256xf32, #tpu.memory_space<vmem>>, vector<16x256xf32>,
      %cst_70 = arith.constant 0.000000e+00 : f32
      %180 = vector.broadcast %cst_70 : f32 to vector<16x256xf32>
      %c0_71 = arith.constant 0 : index
      %c0_72 = arith.constant 0 : index
      %181 = vector.load %arg5[%c0_71, %c0_72] : memref<16x256xf32, #tpu.memory_space<vmem>>, vector<16x256xf32>
      tpu.vector_store %arg5[%c0_71, %c0_72], %180 {strides = array<i32>} : memref<16x256xf32, #tpu.memory_space<vmem>>, vector<16x256xf32>,
    } else {
    }
    %c0 = arith.constant 0 : index
    %c0_1 = arith.constant 0 : index
    %3 = vector.load %arg2[%c0, %c0_1] : memref<256x128xf32, #tpu.memory_space<vmem>>, vector<256x128xf32>
    %c0_2 = arith.constant 0 : index
    %c0_3 = arith.constant 0 : index
    %4 = vector.load %arg3[%c0_2, %c0_3] : memref<128x256xf32, #tpu.memory_space<vmem>>, vector<128x256xf32>
    %cst = arith.constant dense<0.000000e+00> : vector<256x256xf32>
    %5 = tpu.matmul %3, %4, %cst {dimension_numbers = #tpu.dot_dimension_numbers<[1], [0], [0], [1], [0, 0, 1, 1], [], []>} : vector<256x128xf32>, vector<128x256xf32>, vector<256x256xf32> -> vector<256x256xf32>
    %c0_4 = arith.constant 0 : index
    %c0_5 = arith.constant 0 : index
    %6 = vector.load %arg4[%c0_4, %c0_5] : memref<1x256xf32, #tpu.memory_space<vmem>>, vector<1x256xf32>
    %7 = vector.broadcast %6 : vector<1x256xf32> to vector<256x256xf32>
    %8 = arith.addf %5, %7 : vector<256x256xf32>
    %c0_6 = arith.constant 0 : index
    %c0_7 = arith.constant 0 : index
    %9 = vector.load %arg7[%c0_6, %c0_7] : memref<256x256xf32, #tpu.memory_space<vmem>>, vector<256x256xf32>
    tpu.vector_store %arg7[%c0_6, %c0_7], %8 {strides = array<i32>} : memref<256x256xf32, #tpu.memory_space<vmem>>, vector<256x256xf32>,
    %c0_8 = arith.constant 0 : index
    %c0_9 = arith.constant 0 : index
    %10 = vector.load %arg6[%c0_8, %c0_9] : memref<16x256xf32, #tpu.memory_space<vmem>>, vector<16x256xf32>
    %c0_10 = arith.constant 0 : index
    %c0_11 = arith.constant 0 : index
    %11 = vector.load %arg5[%c0_10, %c0_11] : memref<16x256xf32, #tpu.memory_space<vmem>>, vector<16x256xf32>
    %c0_12 = arith.constant 0 : index
    %c0_13 = arith.constant 0 : index
    %12 = vector.load %arg7[%c0_12, %c0_13] : memref<256x256xf32, #tpu.memory_space<vmem>>, vector<16x256xf32>
    %cst_14 = arith.constant 1.000000e+00 : f32
    %13 = vector.broadcast %cst_14 : f32 to vector<16x256xf32>
    %14 = arith.cmpf ogt, %10, %13 : vector<16x256xf32>
    %15 = arith.addf %10, %12 : vector<16x256xf32>
    %16 = arith.select %14, %12, %15 : vector<16x256xi1>, vector<16x256xf32>
    %cst_15 = arith.constant 1.000000e+00 : f32
    %17 = vector.broadcast %cst_15 : f32 to vector<16x256xf32>
    %18 = arith.cmpf ogt, %16, %17 : vector<16x256xf32>
    %19 = arith.extui %18 : vector<16x256xi1> to vector<16x256xi32>
    %20 = arith.sitofp %19 : vector<16x256xi32> to vector<16x256xf32>
    %21 = arith.addf %11, %20 : vector<16x256xf32>
    %c16 = arith.constant 16 : index
    %c0_16 = arith.constant 0 : index
    %22 = vector.load %arg7[%c16, %c0_16] : memref<256x256xf32, #tpu.memory_space<vmem>>, vector<16x256xf32>
    %cst_17 = arith.constant 1.000000e+00 : f32
    %23 = vector.broadcast %cst_17 : f32 to vector<16x256xf32>
    %24 = arith.cmpf ogt, %16, %23 : vector<16x256xf32>
    %25 = arith.addf %16, %22 : vector<16x256xf32>
    %26 = arith.select %24, %22, %25 : vector<16x256xi1>, vector<16x256xf32>
    %cst_18 = arith.constant 1.000000e+00 : f32
    %27 = vector.broadcast %cst_18 : f32 to vector<16x256xf32>
    %28 = arith.cmpf ogt, %26, %27 : vector<16x256xf32>
    %29 = arith.extui %28 : vector<16x256xi1> to vector<16x256xi32>
    %30 = arith.sitofp %29 : vector<16x256xi32> to vector<16x256xf32>
    %31 = arith.addf %21, %30 : vector<16x256xf32>
    %c32 = arith.constant 32 : index
    %c0_19 = arith.constant 0 : index
    %32 = vector.load %arg7[%c32, %c0_19] : memref<256x256xf32, #tpu.memory_space<vmem>>, vector<16x256xf32>
    %cst_20 = arith.constant 1.000000e+00 : f32
    %33 = vector.broadcast %cst_20 : f32 to vector<16x256xf32>
    %34 = arith.cmpf ogt, %26, %33 : vector<16x256xf32>
    %35 = arith.addf %26, %32 : vector<16x256xf32>
    %36 = arith.select %34, %32, %35 : vector<16x256xi1>, vector<16x256xf32>
    %cst_21 = arith.constant 1.000000e+00 : f32
    %37 = vector.broadcast %cst_21 : f32 to vector<16x256xf32>
    %38 = arith.cmpf ogt, %36, %37 : vector<16x256xf32>
    %39 = arith.extui %38 : vector<16x256xi1> to vector<16x256xi32>
    %40 = arith.sitofp %39 : vector<16x256xi32> to vector<16x256xf32>
    %41 = arith.addf %31, %40 : vector<16x256xf32>
    %c48 = arith.constant 48 : index
    %c0_22 = arith.constant 0 : index
    %42 = vector.load %arg7[%c48, %c0_22] : memref<256x256xf32, #tpu.memory_space<vmem>>, vector<16x256xf32>
    %cst_23 = arith.constant 1.000000e+00 : f32
    %43 = vector.broadcast %cst_23 : f32 to vector<16x256xf32>
    %44 = arith.cmpf ogt, %36, %43 : vector<16x256xf32>
    %45 = arith.addf %36, %42 : vector<16x256xf32>
    %46 = arith.select %44, %42, %45 : vector<16x256xi1>, vector<16x256xf32>
    %cst_24 = arith.constant 1.000000e+00 : f32
    %47 = vector.broadcast %cst_24 : f32 to vector<16x256xf32>
    %48 = arith.cmpf ogt, %46, %47 : vector<16x256xf32>
    %49 = arith.extui %48 : vector<16x256xi1> to vector<16x256xi32>
    %50 = arith.sitofp %49 : vector<16x256xi32> to vector<16x256xf32>
    %51 = arith.addf %41, %50 : vector<16x256xf32>
    %c64 = arith.constant 64 : index
    %c0_25 = arith.constant 0 : index
    %52 = vector.load %arg7[%c64, %c0_25] : memref<256x256xf32, #tpu.memory_space<vmem>>, vector<16x256xf32>
    %cst_26 = arith.constant 1.000000e+00 : f32
    %53 = vector.broadcast %cst_26 : f32 to vector<16x256xf32>
    %54 = arith.cmpf ogt, %46, %53 : vector<16x256xf32>
    %55 = arith.addf %46, %52 : vector<16x256xf32>
    %56 = arith.select %54, %52, %55 : vector<16x256xi1>, vector<16x256xf32>
    %cst_27 = arith.constant 1.000000e+00 : f32
    %57 = vector.broadcast %cst_27 : f32 to vector<16x256xf32>
    %58 = arith.cmpf ogt, %56, %57 : vector<16x256xf32>
    %59 = arith.extui %58 : vector<16x256xi1> to vector<16x256xi32>
    %60 = arith.sitofp %59 : vector<16x256xi32> to vector<16x256xf32>
    %61 = arith.addf %51, %60 : vector<16x256xf32>
    %c80 = arith.constant 80 : index
    %c0_28 = arith.constant 0 : index
    %62 = vector.load %arg7[%c80, %c0_28] : memref<256x256xf32, #tpu.memory_space<vmem>>, vector<16x256xf32>
    %cst_29 = arith.constant 1.000000e+00 : f32
    %63 = vector.broadcast %cst_29 : f32 to vector<16x256xf32>
    %64 = arith.cmpf ogt, %56, %63 : vector<16x256xf32>
    %65 = arith.addf %56, %62 : vector<16x256xf32>
    %66 = arith.select %64, %62, %65 : vector<16x256xi1>, vector<16x256xf32>
    %cst_30 = arith.constant 1.000000e+00 : f32
    %67 = vector.broadcast %cst_30 : f32 to vector<16x256xf32>
    %68 = arith.cmpf ogt, %66, %67 : vector<16x256xf32>
    %69 = arith.extui %68 : vector<16x256xi1> to vector<16x256xi32>
    %70 = arith.sitofp %69 : vector<16x256xi32> to vector<16x256xf32>
    %71 = arith.addf %61, %70 : vector<16x256xf32>
    %c96 = arith.constant 96 : index
    %c0_31 = arith.constant 0 : index
    %72 = vector.load %arg7[%c96, %c0_31] : memref<256x256xf32, #tpu.memory_space<vmem>>, vector<16x256xf32>
    %cst_32 = arith.constant 1.000000e+00 : f32
    %73 = vector.broadcast %cst_32 : f32 to vector<16x256xf32>
    %74 = arith.cmpf ogt, %66, %73 : vector<16x256xf32>
    %75 = arith.addf %66, %72 : vector<16x256xf32>
    %76 = arith.select %74, %72, %75 : vector<16x256xi1>, vector<16x256xf32>
    %cst_33 = arith.constant 1.000000e+00 : f32
    %77 = vector.broadcast %cst_33 : f32 to vector<16x256xf32>
    %78 = arith.cmpf ogt, %76, %77 : vector<16x256xf32>
    %79 = arith.extui %78 : vector<16x256xi1> to vector<16x256xi32>
    %80 = arith.sitofp %79 : vector<16x256xi32> to vector<16x256xf32>
    %81 = arith.addf %71, %80 : vector<16x256xf32>
    %c112 = arith.constant 112 : index
    %c0_34 = arith.constant 0 : index
    %82 = vector.load %arg7[%c112, %c0_34] : memref<256x256xf32, #tpu.memory_space<vmem>>, vector<16x256xf32>
    %cst_35 = arith.constant 1.000000e+00 : f32
    %83 = vector.broadcast %cst_35 : f32 to vector<16x256xf32>
    %84 = arith.cmpf ogt, %76, %83 : vector<16x256xf32>
    %85 = arith.addf %76, %82 : vector<16x256xf32>
    %86 = arith.select %84, %82, %85 : vector<16x256xi1>, vector<16x256xf32>
    %cst_36 = arith.constant 1.000000e+00 : f32
    %87 = vector.broadcast %cst_36 : f32 to vector<16x256xf32>
    %88 = arith.cmpf ogt, %86, %87 : vector<16x256xf32>
    %89 = arith.extui %88 : vector<16x256xi1> to vector<16x256xi32>
    %90 = arith.sitofp %89 : vector<16x256xi32> to vector<16x256xf32>
    %91 = arith.addf %81, %90 : vector<16x256xf32>
    %c128 = arith.constant 128 : index
    %c0_37 = arith.constant 0 : index
    %92 = vector.load %arg7[%c128, %c0_37] : memref<256x256xf32, #tpu.memory_space<vmem>>, vector<16x256xf32>
    %cst_38 = arith.constant 1.000000e+00 : f32
    %93 = vector.broadcast %cst_38 : f32 to vector<16x256xf32>
    %94 = arith.cmpf ogt, %86, %93 : vector<16x256xf32>
    %95 = arith.addf %86, %92 : vector<16x256xf32>
    %96 = arith.select %94, %92, %95 : vector<16x256xi1>, vector<16x256xf32>
    %cst_39 = arith.constant 1.000000e+00 : f32
    %97 = vector.broadcast %cst_39 : f32 to vector<16x256xf32>
    %98 = arith.cmpf ogt, %96, %97 : vector<16x256xf32>
    %99 = arith.extui %98 : vector<16x256xi1> to vector<16x256xi32>
    %100 = arith.sitofp %99 : vector<16x256xi32> to vector<16x256xf32>
    %101 = arith.addf %91, %100 : vector<16x256xf32>
    %c144 = arith.constant 144 : index
    %c0_40 = arith.constant 0 : index
    %102 = vector.load %arg7[%c144, %c0_40] : memref<256x256xf32, #tpu.memory_space<vmem>>, vector<16x256xf32>
    %cst_41 = arith.constant 1.000000e+00 : f32
    %103 = vector.broadcast %cst_41 : f32 to vector<16x256xf32>
    %104 = arith.cmpf ogt, %96, %103 : vector<16x256xf32>
    %105 = arith.addf %96, %102 : vector<16x256xf32>
    %106 = arith.select %104, %102, %105 : vector<16x256xi1>, vector<16x256xf32>
    %cst_42 = arith.constant 1.000000e+00 : f32
    %107 = vector.broadcast %cst_42 : f32 to vector<16x256xf32>
    %108 = arith.cmpf ogt, %106, %107 : vector<16x256xf32>
    %109 = arith.extui %108 : vector<16x256xi1> to vector<16x256xi32>
    %110 = arith.sitofp %109 : vector<16x256xi32> to vector<16x256xf32>
    %111 = arith.addf %101, %110 : vector<16x256xf32>
    %c160 = arith.constant 160 : index
    %c0_43 = arith.constant 0 : index
    %112 = vector.load %arg7[%c160, %c0_43] : memref<256x256xf32, #tpu.memory_space<vmem>>, vector<16x256xf32>
    %cst_44 = arith.constant 1.000000e+00 : f32
    %113 = vector.broadcast %cst_44 : f32 to vector<16x256xf32>
    %114 = arith.cmpf ogt, %106, %113 : vector<16x256xf32>
    %115 = arith.addf %106, %112 : vector<16x256xf32>
    %116 = arith.select %114, %112, %115 : vector<16x256xi1>, vector<16x256xf32>
    %cst_45 = arith.constant 1.000000e+00 : f32
    %117 = vector.broadcast %cst_45 : f32 to vector<16x256xf32>
    %118 = arith.cmpf ogt, %116, %117 : vector<16x256xf32>
    %119 = arith.extui %118 : vector<16x256xi1> to vector<16x256xi32>
    %120 = arith.sitofp %119 : vector<16x256xi32> to vector<16x256xf32>
    %121 = arith.addf %111, %120 : vector<16x256xf32>
    %c176 = arith.constant 176 : index
    %c0_46 = arith.constant 0 : index
    %122 = vector.load %arg7[%c176, %c0_46] : memref<256x256xf32, #tpu.memory_space<vmem>>, vector<16x256xf32>
    %cst_47 = arith.constant 1.000000e+00 : f32
    %123 = vector.broadcast %cst_47 : f32 to vector<16x256xf32>
    %124 = arith.cmpf ogt, %116, %123 : vector<16x256xf32>
    %125 = arith.addf %116, %122 : vector<16x256xf32>
    %126 = arith.select %124, %122, %125 : vector<16x256xi1>, vector<16x256xf32>
    %cst_48 = arith.constant 1.000000e+00 : f32
    %127 = vector.broadcast %cst_48 : f32 to vector<16x256xf32>
    %128 = arith.cmpf ogt, %126, %127 : vector<16x256xf32>
    %129 = arith.extui %128 : vector<16x256xi1> to vector<16x256xi32>
    %130 = arith.sitofp %129 : vector<16x256xi32> to vector<16x256xf32>
    %131 = arith.addf %121, %130 : vector<16x256xf32>
    %c192 = arith.constant 192 : index
    %c0_49 = arith.constant 0 : index
    %132 = vector.load %arg7[%c192, %c0_49] : memref<256x256xf32, #tpu.memory_space<vmem>>, vector<16x256xf32>
    %cst_50 = arith.constant 1.000000e+00 : f32
    %133 = vector.broadcast %cst_50 : f32 to vector<16x256xf32>
    %134 = arith.cmpf ogt, %126, %133 : vector<16x256xf32>
    %135 = arith.addf %126, %132 : vector<16x256xf32>
    %136 = arith.select %134, %132, %135 : vector<16x256xi1>, vector<16x256xf32>
    %cst_51 = arith.constant 1.000000e+00 : f32
    %137 = vector.broadcast %cst_51 : f32 to vector<16x256xf32>
    %138 = arith.cmpf ogt, %136, %137 : vector<16x256xf32>
    %139 = arith.extui %138 : vector<16x256xi1> to vector<16x256xi32>
    %140 = arith.sitofp %139 : vector<16x256xi32> to vector<16x256xf32>
    %141 = arith.addf %131, %140 : vector<16x256xf32>
    %c208 = arith.constant 208 : index
    %c0_52 = arith.constant 0 : index
    %142 = vector.load %arg7[%c208, %c0_52] : memref<256x256xf32, #tpu.memory_space<vmem>>, vector<16x256xf32>
    %cst_53 = arith.constant 1.000000e+00 : f32
    %143 = vector.broadcast %cst_53 : f32 to vector<16x256xf32>
    %144 = arith.cmpf ogt, %136, %143 : vector<16x256xf32>
    %145 = arith.addf %136, %142 : vector<16x256xf32>
    %146 = arith.select %144, %142, %145 : vector<16x256xi1>, vector<16x256xf32>
    %cst_54 = arith.constant 1.000000e+00 : f32
    %147 = vector.broadcast %cst_54 : f32 to vector<16x256xf32>
    %148 = arith.cmpf ogt, %146, %147 : vector<16x256xf32>
    %149 = arith.extui %148 : vector<16x256xi1> to vector<16x256xi32>
    %150 = arith.sitofp %149 : vector<16x256xi32> to vector<16x256xf32>
    %151 = arith.addf %141, %150 : vector<16x256xf32>
    %c224 = arith.constant 224 : index
    %c0_55 = arith.constant 0 : index
    %152 = vector.load %arg7[%c224, %c0_55] : memref<256x256xf32, #tpu.memory_space<vmem>>, vector<16x256xf32>
    %cst_56 = arith.constant 1.000000e+00 : f32
    %153 = vector.broadcast %cst_56 : f32 to vector<16x256xf32>
    %154 = arith.cmpf ogt, %146, %153 : vector<16x256xf32>
    %155 = arith.addf %146, %152 : vector<16x256xf32>
    %156 = arith.select %154, %152, %155 : vector<16x256xi1>, vector<16x256xf32>
    %cst_57 = arith.constant 1.000000e+00 : f32
    %157 = vector.broadcast %cst_57 : f32 to vector<16x256xf32>
    %158 = arith.cmpf ogt, %156, %157 : vector<16x256xf32>
    %159 = arith.extui %158 : vector<16x256xi1> to vector<16x256xi32>
    %160 = arith.sitofp %159 : vector<16x256xi32> to vector<16x256xf32>
    %161 = arith.addf %151, %160 : vector<16x256xf32>
    %c240 = arith.constant 240 : index
    %c0_58 = arith.constant 0 : index
    %162 = vector.load %arg7[%c240, %c0_58] : memref<256x256xf32, #tpu.memory_space<vmem>>, vector<16x256xf32>
    %cst_59 = arith.constant 1.000000e+00 : f32
    %163 = vector.broadcast %cst_59 : f32 to vector<16x256xf32>
    %164 = arith.cmpf ogt, %156, %163 : vector<16x256xf32>
    %165 = arith.addf %156, %162 : vector<16x256xf32>
    %166 = arith.select %164, %162, %165 : vector<16x256xi1>, vector<16x256xf32>
    %cst_60 = arith.constant 1.000000e+00 : f32
    %167 = vector.broadcast %cst_60 : f32 to vector<16x256xf32>
    %168 = arith.cmpf ogt, %166, %167 : vector<16x256xf32>
    %169 = arith.extui %168 : vector<16x256xi1> to vector<16x256xi32>
    %170 = arith.sitofp %169 : vector<16x256xi32> to vector<16x256xf32>
    %171 = arith.addf %161, %170 : vector<16x256xf32>
    %c0_61 = arith.constant 0 : index
    %c0_62 = arith.constant 0 : index
    %172 = vector.load %arg6[%c0_61, %c0_62] : memref<16x256xf32, #tpu.memory_space<vmem>>, vector<16x256xf32>
    tpu.vector_store %arg6[%c0_61, %c0_62], %166 {strides = array<i32>} : memref<16x256xf32, #tpu.memory_space<vmem>>, vector<16x256xf32>,
    %c1_i32 = arith.constant 1 : i32
    %173 = arith.cmpi eq, %arg1, %c1_i32 : i32
    %cst_63 = arith.constant 3.125000e-02 : f32
    %cst_64 = arith.constant 1.000000e+00 : f32
    %174 = arith.select %173, %cst_63, %cst_64 : f32
    %175 = vector.broadcast %174 : f32 to vector<16x256xf32>
    %176 = arith.mulf %171, %175 : vector<16x256xf32>
    %c0_65 = arith.constant 0 : index
    %c0_66 = arith.constant 0 : index
    %177 = vector.load %arg5[%c0_65, %c0_66] : memref<16x256xf32, #tpu.memory_space<vmem>>, vector<16x256xf32>
    tpu.vector_store %arg5[%c0_65, %c0_66], %176 {strides = array<i32>} : memref<16x256xf32, #tpu.memory_space<vmem>>, vector<16x256xf32>,
    return
  }
  func.func @transform_0(%arg0: i32, %arg1: i32) -> (i32, i32) {
    %c0_i32 = arith.constant 0 : i32
    %c0_i32_0 = arith.constant 0 : i32
    return %arg1, %c0_i32 : i32, i32
  }
  func.func @transform_1(%arg0: i32, %arg1: i32) -> (i32, i32) {
    %c0_i32 = arith.constant 0 : i32
    %c0_i32_0 = arith.constant 0 : i32
    return %c0_i32, %arg0 : i32, i32
  }
  func.func @transform_2(%arg0: i32, %arg1: i32) -> (i32, i32) {
    %c0_i32 = arith.constant 0 : i32
    %c0_i32_0 = arith.constant 0 : i32
    return %c0_i32, %arg0 : i32, i32
  }
  func.func @transform_3(%arg0: i32, %arg1: i32) -> (i32, i32) {
    %c0_i32 = arith.constant 0 : i32
    %c0_i32_0 = arith.constant 0 : i32
    return %c0_i32, %arg0 : i32, i32
  }
}

</mosaic_0001>

<bundles_post_ra>
// kernel: tpu_custom_call.1
= control target key start
LH: loop header
LB: loop body
LE: loop exit
PB: predicated region body
PF: predicated region fallthrough
CT: control target
= control target key end

     0   :  { %s2499_s0 = inlined_call_operand.hbm [shape: f32[512,128], index: 0, kind: input, shape index: {}]   ;;  %s2500_s1 = inlined_call_operand.hbm [shape: f32[128,512], index: 1, kind: input, shape index: {}]   ;;  %s2501_s2 = inlined_call_operand.hbm [shape: f32[1,512], index: 2, kind: input, shape index: {}]   ;;  %s2502_s3 = inlined_call_operand.hbm [shape: f32[16,512], index: 3, kind: output, shape index: {}]  }
   0x1   :  { %2514 = sst [smem:[#allocation24_spill]] %s2500_s1 }
   0x2   :  { %2515 = sst [smem:[#allocation25_spill]] %s2502_s3 }
   0x3   :  { %8 = vsyncpa [#allocation5], 0 }
   0x4   :  { %10 = vsyncpa [#allocation5 + $0x1], 0 }
   0x5   :  { %11 = vsyncpa [#allocation8], 0 }
   0x6   :  { %13 = vsyncpa [#allocation8 + $0x1], 0 }
   0x7   :  { %14 = vsyncpa [#allocation6], 0 }
   0x8   :  { %16 = vsyncpa [#allocation6 + $0x1], 0  ;;  %s1767_s12 = smov 0   ;;  %s1769_s13 = smov 0  }
   0x9   :  { %s1771_s14 = smov 0   ;;  %s1773_s15 = smov 0  }
   0xa   :  { %s1775_s16 = smov 0   ;;  %s1777_s17 = smov 0  }
   0xb   :  { %s1779_s18 = smov 0   ;;  %s1781_s19 = smov 0  }
   0xc   :  { %s1783_s20 = smov 0   ;;  %s1785_s21 = smov 0  }
   0xd   :  { %s1787_s22 = smov 0  }
   0xe LB: > { %2516 = sst [smem:[#allocation14_spill]] %s1695_s12  ;;  %s1823_s23 = sadd.s32 4294967295, %s1735_s22   ;;  %s1735_s22 = sphi %s1787_s22, %s22_s22   ;;  %s1731_s21 = sphi %s1785_s21, %s2555_s21   ;;  %s1727_s20 = sphi %s1783_s20, %s2546_s20   ;;  %s1723_s19 = sphi %s1781_s19, %s2554_s19   ;;  %s1719_s18 = sphi %s1779_s18, %s2553_s18   ;;  %s1715_s17 = sphi %s1777_s17, %s2544_s17   ;;  %s1711_s16 = sphi %s1775_s16, %s2552_s16   ;;  %s1707_s15 = sphi %s1773_s15, %s2551_s15   ;;  %s1703_s14 = sphi %s1771_s14, %s2550_s14   ;;  %s1699_s13 = sphi %s1769_s13, %s2549_s13   ;;  %s1695_s12 = sphi %s1767_s12, %s2548_s12  }
   0xf   : > { %2517 = sst [smem:[#allocation15_spill]] %s1715_s17  ;;  %s1276_s24 = sadd.s32 4294967294, %s1735_s22  }
  0x10   : > { %2518 = sst [smem:[#allocation16_spill]] %s1723_s19  ;;  %p49_p0 = scmp.eq.s32.totalorder %s1735_s22, 0 }
  0x11   : > { %2519 = sst [smem:[#allocation17_spill]] %s1727_s20  ;;  %s67_s25 = sadd.s32 1, %s1703_s14 }
  0x12   : > { %p74_p1 = scmp.ne.s32.totalorder %s1703_s14, %s1699_s13  ;;  %p80_p2 = scmp.ne.s32.totalorder %s1699_s13, %s1695_s12 }
  0x13   : > { %p130_p3 = scmp.eq.s32.totalorder %s1823_s23, 3  ;;  %p136_p4 = scmp.eq.s32.totalorder %s1276_s24, 3 }
  0x14   : > { %p1835_p5 = por %p74_p1, %p49_p0  ;;  %p2503_p8 = scmp.lt.s32.totalorder %s1735_s22, 4 }
  0x15   : > { %p1839_p6 = por %p130_p3, %p74_p1  ;;  %p1846_p7 = por %p136_p4, %p80_p2 }
  0x16   : > { %s178_s29 = sand.u32 1, %s1735_s22   ;;  %s2504_s30 = sand.u32 1, %s1703_s14  }
  0x17   : > { %s2521_s27 = scalar_select %p1839_p6, 1, 0 }
  0x18   : > { %s2523_s28 = scalar_select %p1846_p7, 1, 0 }
  0x19   : > { %2522 = sst [smem:[#allocation18_spill]] %s2521_s27  ;;  %s1282_s4 = sshll.u32 %s2504_s30, 8 }
  0x1a   : > { %2524 = sst [smem:[#allocation19_spill]] %s2523_s28  ;;  %s1363_s5 = sshll.u32 %s1731_s21, 4 }
  0x1b   : > { %s2525_s1 = sld [smem:[#allocation24_spill]]  ;;  %s182_s10 = scalar_lea.vmem [#allocation7], %s1282_s4 }
  0x1c   : > { %s190_s11 = sshll.u32 %s182_s10, 4  ;;  %p1863_p9 = pnand %p2503_p8, %p1835_p5  ;;  %s191_s11 = int_to_ptr.vmem [resolvable:$true] %s190_s11 }
  0x1d   : > { %p1287_p10 = scmp.ge.s32.totalorder %s1735_s22, 1  ;;  %s1737_s4 = smov 512  }
  0x1e   : > { %s1738_s6 = smov 256   ;;  %s1739_s7 = smov 16  }
  0x1f   : > { %p217_p11 = scmp.lt.s32.totalorder %s1735_s22, 5  ;;  %s34_s10 = sadd.s32 1, %s1731_s21 }
  0x20   : > { %p48_p1 = scmp.ne.s32.totalorder %s1715_s17, %s1711_s16  ;;  %p54_p3 = scmp.ne.s32.totalorder %s1711_s16, %s1707_s15 }
  0x21   : > { %s187_s8 = scalar_lea.hbm %s2525_s1, %s1363_s5  ;;  %s1868_s5 = scalar_lea.sflag [#allocation8], %s178_s29 }
  0x22   : > { %s188_s9 = sshll.u32 %s187_s8, 4  ;;  %p1874_p12 = pnand %p1287_p10, %p217_p11  ;;  %s189_s9 = int_to_ptr.hbm [resolvable:$true] %s188_s9 }
  0x23   : > { %1411 = dma.hbm_to_vmem [thread:$0]  (!%p1863_p9), %s189_s9, 4096, %s191_s11, %s1868_s5, %s1737_s4, %s1738_s6, %s1739_s7  }
  0x24   : > { %s31_s8 = sadd.s32 1, %s1727_s20  ;;  %s41_s29 = sadd.s32 1, %s1715_s17 }
  0x25   : > { %p32_p13 = scmp.ge.s32.totalorder %s31_s8, 2  ;;  %p1892_p4 = por %p49_p0, %p48_p1 }
  0x26   : > { %p55_p11 = scmp.eq.s32.totalorder %s1823_s23, 0  ;;  %s156_s4 = sand.u32 1, %s1715_s17  }
  0x27   : > { %s2557_s8 = smov (%p32_p13, %s31_s8), 0  ;;  %s2559_s10 = smov (!%p32_p13, %s34_s10), %s1731_s21 }
  0x28   : > { %2528 = sst [smem:[#allocation20_spill]] %s2557_s8  ;;  %s38_s9 = ssub.s32 %s1727_s20, %s2557_s8 }
  0x29   : > { %p36_p5 = scmp.ge.s32.totalorder %s2559_s10, 2  ;;  %p39_p10 = scmp.eq.s32.totalorder %s38_s9, 0 }
  0x2a   : > { %p1903_p8 = por %p55_p11, %p54_p3  ;;  %p1912_p13 = por %p80_p2, %p55_p11 }
  0x2b   : > { %s2561_s10 = smov (%p36_p5, %s2559_s10), 0  ;;  %s1279_s9 = sshll.u32 %s156_s4, 8 }
  0x2c   : > { %2530 = sst [smem:[#allocation21_spill]] %s2561_s10  ;;  %s64_s7 = ssub.s32 %s1731_s21, %s2561_s10 }
  0x2d   : > { %s1901_s15 = scalar_select %p39_p10, %s1715_s17, %s41_s29  }
  0x2e   : > { %p65_p0 = scmp.eq.s32.totalorder %s64_s7, 0  ;;  %s1362_s8 = sshll.u32 %s1727_s20, 8 }
  0x2f   : > { %2531 = sst [smem:[#allocation22_spill]] %s1901_s15  ;;  %s165_s15 = scalar_lea.hbm %s2499_s0, %s1362_s8 }
  0x30   : > { %s1919_s1 = scalar_select %p65_p0, %s1703_s14, %s67_s25  }
  0x31   : > { %s160_s17 = scalar_lea.vmem [#allocation4], %s1279_s9  ;;  %s166_s3 = sshll.u32 %s165_s15, 4  ;;  %s167_s3 = int_to_ptr.hbm [resolvable:$true] %s166_s3 }
  0x32   : > { %2534 = sst [smem:[#allocation23_spill]] %s1919_s1  ;;  %s168_s27 = sshll.u32 %s160_s17, 4  ;;  %s169_s27 = int_to_ptr.vmem [resolvable:$true] %s168_s27 }
  0x33   : > { %p2535_p2 = scmp.lt.s32.totalorder %s1735_s22, 4  ;;  %s2536_s7 = sand.u32 1, %s1703_s14  }
  0x34   : > { %s1285_s10 = sshll.u32 %s2536_s7, 1  ;;  %s157_s12 = scalar_lea.sflag [#allocation5], %s156_s4 }
  0x35   : > { %p1406_p1 = pnand %p2535_p2, %p1892_p4  ;;  %s1740_s25 = smov 128  }
  0x36   : > { %s1741_s1 = smov 8   ;;  %s1286_s20 = sshll.u32 %s1731_s21, 1 }
  0x37   : > { %1408 = dma.hbm_to_vmem [thread:$0]  (!%p1406_p1), %s167_s3, 4096, %s169_s27, %s157_s12, %s1740_s25, %s1740_s25, %s1741_s1  }
  0x38   : > { %s208_s8 = scalar_lea.hbm %s2501_s2, %s1286_s20  ;;  %s204_s17 = scalar_lea.vmem [#allocation9], %s1285_s10 }
  0x39   : > { %s212_s15 = sshll.u32 %s204_s17, 4  ;;  %s210_s9 = sshll.u32 %s208_s8, 4  ;;  %s213_s15 = int_to_ptr.vmem [resolvable:$true] %s212_s15  ;;  %s211_s9 = int_to_ptr.hbm [resolvable:$true] %s210_s9 }
  0x3a   : > { %1414 = dma.hbm_to_vmem [thread:$0]  (!%p1863_p9), %s211_s9, 32, %s213_s15, %s1868_s5  }
  0x3b   : > { %221 = sbr.rel (%p1874_p12) target bundleno = 420 (0x1a4), region = 32  ;;  %s223_s11 = sand.u32 (!%p1874_p12), 1, %s1711_s16  }
  0x3c   : > { %s1288_s4 = sshll.u32 (!%p1874_p12), %s223_s11, 8  ;;  %s224_s1 = scalar_lea.sflag (!%p1874_p12), [#allocation5], %s223_s11 }
  0x3d   : > { %s1941_s3 = scalar_lea.vmem (!%p1874_p12), [#allocation4], %s1288_s4 }
  0x40   : > { %1682 = dma.done.wait (%p1903_p8), %s224_s1, 4096  }
  0x41   : > { %1684 = vsyncadd (%p1903_p8), %s224_s1, 4294963200  ;;  %s233_s12 = sand.u32 1, %s1823_s23   ;;  %s1949_s19 = sand.u32 1, %s1699_s13  }
  0x42   : > { %s1289_s20 = sshll.u32 %s1949_s19, 8  ;;  %s234_s27 = scalar_lea.sflag [#allocation8], %s233_s12 }
  0x43   : > { %s1952_s24 = scalar_lea.vmem [#allocation7], %s1289_s20 }
  0x44   : > { %1686 = dma.done.wait (%p1912_p13), %s234_s27, 4128  }
  0x45   : > { %1688 = vsyncadd (%p1912_p13), %s234_s27, 4294963168  ;;  %s1290_s5 = sshll.u32 %s1949_s19, 1  ;;  %s1291_s26 = sshll.u32 %s1949_s19, 5 }
  0x46   : > { %s1960_s10 = scalar_lea.vmem [#allocation9], %s1290_s5  ;;  %s1962_s6 = scalar_lea.vmem [#allocation10], %s1291_s26 }
  0x47   : > { %p1292_p8 = scmp.ne.s32.totalorder %s1719_s18, 0 }
  0x49   : > { %288 = sbr.rel (%p1292_p8) target bundleno = 87 (0x57), region = 48 }
  0x4e   : > { %v1742_v0 = vmov 0.0  }
  0x4f   : > { %289 = vst [vmem:[#allocation2 + $0x10] sm:$0xff] %v1742_v0 }
  0x50   : > { %290 = vst [vmem:[#allocation2] sm:$0xff] %v1742_v0 }
  0x51   : > { %291 = vst [vmem:[#allocation2 + $0x18] sm:$0xff] %v1742_v0 }
  0x52   : > { %292 = vst [vmem:[#allocation2 + $0x8] sm:$0xff] %v1742_v0 }
  0x53   : > { %293 = vst [vmem:[%s1962_s6] sm:$0xff] %v1742_v0 }
  0x54   : > { %294 = vst [vmem:[%s1962_s6 + $0x8] sm:$0xff] %v1742_v0 }
  0x55   : > { %295 = vst [vmem:[%s1962_s6 + $0x10] sm:$0xff] %v1742_v0 }
  0x56   : > { %296 = vst [vmem:[%s1962_s6 + $0x18] sm:$0xff] %v1742_v0 }
  0x57 PF: > { %v359_v1 = vld [vmem:[%s1952_s24 + $0xf0] sm:$0xff]  ;;  %v360_v2 = vld [vmem:[%s1952_s24 + $0xf8] sm:$0xff]  ;;  %v357_v3 = vld [vmem:[%s1952_s24 + $0xe0] sm:$0xff]  ;;  %p1121_p9 = scmp.eq.s32.totalorder %s1719_s18, 1  ;;  %s2537_s18 = sld [smem:[#allocation16_spill]] }
  0x58   : > { %367 = vmatpush.msra.mxu0 %v359_v1  ;;  %480 = vmatpush.msra.mxu1 %v360_v2  ;;  %v358_v4 = vld [vmem:[%s1952_s24 + $0xe8] sm:$0xff]  ;;  %v355_v5 = vld [vmem:[%s1952_s24 + $0xd0] sm:$0xff]  ;;  %v356_v6 = vld [vmem:[%s1952_s24 + $0xd8] sm:$0xff]  ;;  %s2538_s25 = sld [smem:[#allocation25_spill]]  ;;  %s1145_s8 = sshll.u32 %s1962_s6, 4  ;;  %s1146_s8 = int_to_ptr.vmem [resolvable:$true] %s1145_s8 }
  0x59   : > { %1365 = vmatpush.msra.mxu2 %v359_v1  ;;  %1381 = vmatpush.msra.mxu3 %v360_v2  ;;  %v353_v7 = vld [vmem:[%s1952_s24 + $0xc0] sm:$0xff]  ;;  %v354_v8 = vld [vmem:[%s1952_s24 + $0xc8] sm:$0xff]  ;;  %v351_v9 = vld [vmem:[%s1952_s24 + $0xb0] sm:$0xff]  ;;  %s1122_s23 = scalar_select %p1121_p9, 0.03125, 1.0 }
  0x5a   : > { %368 = vmatpush.msra.mxu0 %v357_v3  ;;  %481 = vmatpush.msra.mxu1 %v358_v4  ;;  %v352_v10 = vld [vmem:[%s1952_s24 + $0xb8] sm:$0xff]  ;;  %v349_v11 = vld [vmem:[%s1952_s24 + $0xa0] sm:$0xff]  ;;  %v350_v12 = vld [vmem:[%s1952_s24 + $0xa8] sm:$0xff]  ;;  %s1133_s9 = scalar_lea.sflag [#allocation6], %s1949_s19 }
  0x5b   : > { %1366 = vmatpush.msra.mxu2 %v357_v3  ;;  %1382 = vmatpush.msra.mxu3 %v358_v4  ;;  %v347_v13 = vld [vmem:[%s1952_s24 + $0x90] sm:$0xff]  ;;  %v348_v14 = vld [vmem:[%s1952_s24 + $0x98] sm:$0xff]  ;;  %v345_v15 = vld [vmem:[%s1952_s24 + $0x80] sm:$0xff] }
  0x5c   : > { %369 = vmatpush.msra.mxu0 %v355_v5  ;;  %482 = vmatpush.msra.mxu1 %v356_v6  ;;  %v346_v16 = vld [vmem:[%s1952_s24 + $0x88] sm:$0xff]  ;;  %v343_v17 = vld [vmem:[%s1952_s24 + $0x70] sm:$0xff]  ;;  %v344_v18 = vld [vmem:[%s1952_s24 + $0x78] sm:$0xff] }
  0x5d   : > { %1367 = vmatpush.msra.mxu2 %v355_v5  ;;  %1383 = vmatpush.msra.mxu3 %v356_v6  ;;  %v341_v19 = vld [vmem:[%s1952_s24 + $0x60] sm:$0xff]  ;;  %v342_v20 = vld [vmem:[%s1952_s24 + $0x68] sm:$0xff]  ;;  %v339_v21 = vld [vmem:[%s1952_s24 + $0x50] sm:$0xff]  ;;  %s1364_s30 = sshll.u32 %s2537_s18, 4 }
  0x5e   : > { %370 = vmatpush.msra.mxu0 %v353_v7  ;;  %483 = vmatpush.msra.mxu1 %v354_v8  ;;  %v340_v22 = vld [vmem:[%s1952_s24 + $0x58] sm:$0xff]  ;;  %v337_v23 = vld [vmem:[%s1952_s24 + $0x40] sm:$0xff]  ;;  %v338_v24 = vld [vmem:[%s1952_s24 + $0x48] sm:$0xff]  ;;  %s1144_s28 = scalar_lea.hbm %s2538_s25, %s1364_s30  ;;  %s1629_s12 = scalar_lea.hbm %s2538_s25, 64 }
  0x5f   : > { %1368 = vmatpush.msra.mxu2 %v353_v7  ;;  %1384 = vmatpush.msra.mxu3 %v354_v8  ;;  %v335_v25 = vld [vmem:[%s1952_s24 + $0x30] sm:$0xff]  ;;  %v336_v26 = vld [vmem:[%s1952_s24 + $0x38] sm:$0xff]  ;;  %v333_v27 = vld [vmem:[%s1952_s24 + $0x20] sm:$0xff]  ;;  %s1147_s15 = sshll.u32 %s1144_s28, 4  ;;  %s1148_s15 = int_to_ptr.hbm [resolvable:$true] %s1147_s15 }
  0x60   : > { %371 = vmatpush.msra.mxu0 %v351_v9  ;;  %484 = vmatpush.msra.mxu1 %v352_v10  ;;  %v334_v28 = vld [vmem:[%s1952_s24 + $0x28] sm:$0xff]  ;;  %v331_v29 = vld [vmem:[%s1952_s24 + $0x10] sm:$0xff]  ;;  %v332_v30 = vld [vmem:[%s1952_s24 + $0x18] sm:$0xff]  ;;  %s1623_s11 = sshra.s32 %s1148_s15, 4  ;;  %s1624_s11 = int_to_ptr.hbm [resolvable:$true] %s1623_s11 }
  0x61   : > { %1369 = vmatpush.msra.mxu2 %v351_v9  ;;  %1385 = vmatpush.msra.mxu3 %v352_v10  ;;  %v329_v31 = vld [vmem:[%s1952_s24] sm:$0xff]  ;;  %v330_v32 = vld [vmem:[%s1952_s24 + $0x8] sm:$0xff]  ;;  %v299_v37 = vld [vmem:[%s1941_s3 + $0x10] sm:$0xff]  ;;  %s1625_s4 = scalar_lea.hbm %s1624_s11, 32  ;;  %p1630_p5 = scmp.lt.s32.totalorder %s1624_s11, %s2538_s25 }
  0x62   : > { %372 = vmatpush.msra.mxu0 %v349_v11  ;;  %485 = vmatpush.msra.mxu1 %v350_v12  ;;  %v297_v33 = vld [vmem:[%s1941_s3] sm:$0xff]  ;;  %v298_v35 = vld [vmem:[%s1941_s3 + $0x8] sm:$0xff]  ;;  %v315_v38 = vld [vmem:[%s1941_s3 + $0x90] sm:$0xff]  ;;  %p1626_p12 = scmp.ne.s32.totalorder %s1624_s11, %s1625_s4  ;;  %p1631_p10 = scmp.lt.s32.totalorder %s1629_s12, %s1625_s4 }
  0x63   : > { %1370 = vmatpush.msra.mxu2 %v349_v11  ;;  %1386 = vmatpush.msra.mxu3 %v350_v12  ;;  %v313_v34 = vld [vmem:[%s1941_s3 + $0x80] sm:$0xff]  ;;  %v314_v36 = vld [vmem:[%s1941_s3 + $0x88] sm:$0xff]  ;;  %v300_v39 = vld [vmem:[%s1941_s3 + $0x18] sm:$0xff] }
  0x64   : > { %373 = vmatpush.msra.mxu0 %v347_v13  ;;  %486 = vmatpush.msra.mxu1 %v348_v14  ;;  %v316_v40 = vld [vmem:[%s1941_s3 + $0x98] sm:$0xff]  ;;  %v301_v41 = vld [vmem:[%s1941_s3 + $0x20] sm:$0xff]  ;;  %v302_v43 = vld [vmem:[%s1941_s3 + $0x28] sm:$0xff]  ;;  %p1627_p3 = pnand %p1626_p12, %p1839_p6  ;;  %p1632_p11 = por %p1631_p10, %p1630_p5 }
  0x65   : > { %1371 = vmatpush.msra.mxu2 %v347_v13  ;;  %1387 = vmatpush.msra.mxu3 %v348_v14  ;;  %v317_v42 = vld [vmem:[%s1941_s3 + $0xa0] sm:$0xff]  ;;  %v318_v44 = vld [vmem:[%s1941_s3 + $0xa8] sm:$0xff]  ;;  %v303_v45 = vld [vmem:[%s1941_s3 + $0x30] sm:$0xff] }
  0x66   : > { %374 = vmatpush.msra.mxu0 %v345_v15  ;;  %487 = vmatpush.msra.mxu1 %v346_v16  ;;  %v319_v46 = vld [vmem:[%s1941_s3 + $0xb0] sm:$0xff]  ;;  %v304_v47 = vld [vmem:[%s1941_s3 + $0x38] sm:$0xff]  ;;  %v305_v49 = vld [vmem:[%s1941_s3 + $0x40] sm:$0xff]  ;;  %p1628_p4 = pneg %p1627_p3 }
  0x67   : > { %1372 = vmatpush.msra.mxu2 %v345_v15  ;;  %1388 = vmatpush.msra.mxu3 %v346_v16  ;;  %v320_v48 = vld [vmem:[%s1941_s3 + $0xb8] sm:$0xff]  ;;  %v321_v50 = vld [vmem:[%s1941_s3 + $0xc0] sm:$0xff]  ;;  %v306_v51 = vld [vmem:[%s1941_s3 + $0x48] sm:$0xff] }
  0x68   : > { %375 = vmatpush.msra.mxu0 %v343_v17  ;;  %488 = vmatpush.msra.mxu1 %v344_v18  ;;  %v322_v52 = vld [vmem:[%s1941_s3 + $0xc8] sm:$0xff]  ;;  %v307_v53 = vld [vmem:[%s1941_s3 + $0x50] sm:$0xff]  ;;  %v308_v55 = vld [vmem:[%s1941_s3 + $0x58] sm:$0xff]  ;;  %p1633_p0 = pnand %p1632_p11, %p1628_p4 }
  0x69   : > { %1373 = vmatpush.msra.mxu2 %v343_v17  ;;  %1389 = vmatpush.msra.mxu3 %v344_v18  ;;  %v323_v54 = vld [vmem:[%s1941_s3 + $0xd0] sm:$0xff]  ;;  %v324_v56 = vld [vmem:[%s1941_s3 + $0xd8] sm:$0xff]  ;;  %v309_v57 = vld [vmem:[%s1941_s3 + $0x60] sm:$0xff] }
  0x6a   : > { %376 = vmatpush.msra.mxu0 %v341_v19  ;;  %489 = vmatpush.msra.mxu1 %v342_v20  ;;  %v325_v58 = vld [vmem:[%s1941_s3 + $0xe0] sm:$0xff]  ;;  %v310_v59 = vld [vmem:[%s1941_s3 + $0x68] sm:$0xff]  ;;  %v311_v61 = vld [vmem:[%s1941_s3 + $0x70] sm:$0xff] }
  0x6b   : > { %1374 = vmatpush.msra.mxu2 %v341_v19  ;;  %1390 = vmatpush.msra.mxu3 %v342_v20  ;;  %v326_v60 = vld [vmem:[%s1941_s3 + $0xe8] sm:$0xff]  ;;  %v327_v62 = vld [vmem:[%s1941_s3 + $0xf0] sm:$0xff]  ;;  %v312_v63 = vld [vmem:[%s1941_s3 + $0x78] sm:$0xff] }
  0x6c   : > { %377 = vmatpush.msra.mxu0 %v339_v21  ;;  %490 = vmatpush.msra.mxu1 %v340_v22  ;;  %v328_v0 = vld [vmem:[%s1941_s3 + $0xf8] sm:$0xff]  ;;  %v361_v1 = vld [vmem:[%s1960_s10] sm:$0x3]  ;;  %v657_v8 = vld [vmem:[#allocation2 + $0x10] sm:$0xff] }
  0x6d   : > { %1375 = vmatpush.msra.mxu2 %v339_v21  ;;  %1391 = vmatpush.msra.mxu3 %v340_v22  ;;  %v2034_v4 = vperm.slane %v361_v1, 0  ;;  %v2036_v5 = vperm.slane %v361_v1, 1  ;;  %v658_v9 = vld [vmem:[#allocation2] sm:$0xff]  ;;  %vm669_vm0 = vcmp.gt.f32.partialorder %v657_v8, 1.0  ;;  %v659_v20 = vld [vmem:[#allocation2 + $0x18] sm:$0xff]  ;;  %v660_v21 = vld [vmem:[#allocation2 + $0x8] sm:$0xff] }
  0x6e   : > { %378 = vmatpush.msra.mxu0 %v337_v23  ;;  %491 = vmatpush.msra.mxu1 %v338_v24  ;;  %vm670_vm1 = vcmp.gt.f32.partialorder %v658_v9, 1.0  ;;  %vm671_vm4 = vcmp.gt.f32.partialorder %v659_v20, 1.0  ;;  %vm672_vm5 = vcmp.gt.f32.partialorder %v660_v21, 1.0 }
  0x6f   : > { %1376 = vmatpush.msra.mxu2 %v337_v23  ;;  %1392 = vmatpush.msra.mxu3 %v338_v24 }
  0x70   : > { %379 = vmatpush.msra.mxu0 %v335_v25  ;;  %492 = vmatpush.msra.mxu1 %v336_v26 }
  0x71   : > { %1377 = vmatpush.msra.mxu2 %v335_v25  ;;  %1393 = vmatpush.msra.mxu3 %v336_v26 }
  0x72   : > { %380 = vmatpush.msra.mxu0 %v333_v27  ;;  %493 = vmatpush.msra.mxu1 %v334_v28 }
  0x73   : > { %1378 = vmatpush.msra.mxu2 %v333_v27  ;;  %1394 = vmatpush.msra.mxu3 %v334_v28 }
  0x74   : > { %381 = vmatpush.msra.mxu0 %v331_v29  ;;  %494 = vmatpush.msra.mxu1 %v332_v30 }
  0x75   : > { %1379 = vmatpush.msra.mxu2 %v331_v29  ;;  %1395 = vmatpush.msra.mxu3 %v332_v30  ;;  %v661_v30 = vld [vmem:[%s1962_s6] sm:$0xff] }
  0x76   : > { %382 = vmatpush.msra.mxu0 %v329_v31  ;;  %495 = vmatpush.msra.mxu1 %v330_v32 }
  0x77   : > { %383 = vmatmul.f32.vlgmr.msra.gmra.mxu0 %v297_v33  ;;  %496 = vmatmul.f32.vlgmr.msra.gmra.mxu1 %v297_v33 }
  0x78   : > { %1380 = vmatpush.msra.mxu2 %v329_v31  ;;  %1396 = vmatpush.msra.mxu3 %v330_v32  ;;  %v1743_v31 = vmov 0.0  }
  0x79   : > { %431 = vmatmul.f32.vlgmr.msra.gmra.mxu2 %v313_v34  ;;  %544 = vmatmul.f32.vlgmr.msra.gmra.mxu3 %v313_v34  ;;  %v662_v34 = vld [vmem:[%s1962_s6 + $0x8] sm:$0xff] }
  0x7f   : > { %386 = vmatmul.f32.gmra.mxu0 %v298_v35  ;;  %499 = vmatmul.f32.gmra.mxu1 %v298_v35 }
  0x81   : > { %434 = vmatmul.f32.gmra.mxu2 %v314_v36  ;;  %547 = vmatmul.f32.gmra.mxu3 %v314_v36 }
  0x87   : > { %389 = vmatmul.f32.gmra.mxu0 %v299_v37  ;;  %502 = vmatmul.f32.gmra.mxu1 %v299_v37 }
  0x89   : > { %437 = vmatmul.f32.gmra.mxu2 %v315_v38  ;;  %550 = vmatmul.f32.gmra.mxu3 %v315_v38 }
  0x8f   : > { %392 = vmatmul.f32.gmra.mxu0 %v300_v39  ;;  %505 = vmatmul.f32.gmra.mxu1 %v300_v39 }
  0x91   : > { %440 = vmatmul.f32.gmra.mxu2 %v316_v40  ;;  %553 = vmatmul.f32.gmra.mxu3 %v316_v40 }
  0x97   : > { %395 = vmatmul.f32.gmra.mxu0 %v301_v41  ;;  %508 = vmatmul.f32.gmra.mxu1 %v301_v41 }
  0x99   : > { %443 = vmatmul.f32.gmra.mxu2 %v317_v42  ;;  %556 = vmatmul.f32.gmra.mxu3 %v317_v42 }
  0x9f   : > { %398 = vmatmul.f32.gmra.mxu0 %v302_v43  ;;  %511 = vmatmul.f32.gmra.mxu1 %v302_v43 }
  0xa1   : > { %446 = vmatmul.f32.gmra.mxu2 %v318_v44  ;;  %559 = vmatmul.f32.gmra.mxu3 %v318_v44 }
  0xa7   : > { %401 = vmatmul.f32.gmra.mxu0 %v303_v45  ;;  %514 = vmatmul.f32.gmra.mxu1 %v303_v45 }
  0xa9   : > { %449 = vmatmul.f32.gmra.mxu2 %v319_v46  ;;  %562 = vmatmul.f32.gmra.mxu3 %v319_v46 }
  0xaf   : > { %404 = vmatmul.f32.gmra.mxu0 %v304_v47  ;;  %517 = vmatmul.f32.gmra.mxu1 %v304_v47 }
  0xb1   : > { %452 = vmatmul.f32.gmra.mxu2 %v320_v48  ;;  %565 = vmatmul.f32.gmra.mxu3 %v320_v48 }
  0xb7   : > { %407 = vmatmul.f32.gmra.mxu0 %v305_v49  ;;  %520 = vmatmul.f32.gmra.mxu1 %v305_v49 }
  0xb9   : > { %455 = vmatmul.f32.gmra.mxu2 %v321_v50  ;;  %568 = vmatmul.f32.gmra.mxu3 %v321_v50 }
  0xbf   : > { %410 = vmatmul.f32.gmra.mxu0 %v306_v51  ;;  %523 = vmatmul.f32.gmra.mxu1 %v306_v51 }
  0xc1   : > { %458 = vmatmul.f32.gmra.mxu2 %v322_v52  ;;  %571 = vmatmul.f32.gmra.mxu3 %v322_v52 }
  0xc7   : > { %413 = vmatmul.f32.gmra.mxu0 %v307_v53  ;;  %526 = vmatmul.f32.gmra.mxu1 %v307_v53  ;;  %v663_v53 = vld [vmem:[%s1962_s6 + $0x10] sm:$0xff] }
  0xc9   : > { %461 = vmatmul.f32.gmra.mxu2 %v323_v54  ;;  %574 = vmatmul.f32.gmra.mxu3 %v323_v54 }
  0xcf   : > { %416 = vmatmul.f32.gmra.mxu0 %v308_v55  ;;  %529 = vmatmul.f32.gmra.mxu1 %v308_v55 }
  0xd1   : > { %464 = vmatmul.f32.gmra.mxu2 %v324_v56  ;;  %577 = vmatmul.f32.gmra.mxu3 %v324_v56  ;;  %v664_v56 = vld [vmem:[%s1962_s6 + $0x18] sm:$0xff] }
  0xd7   : > { %419 = vmatmul.f32.gmra.mxu0 %v309_v57  ;;  %532 = vmatmul.f32.gmra.mxu1 %v309_v57 }
  0xd9   : > { %467 = vmatmul.f32.gmra.mxu2 %v325_v58  ;;  %580 = vmatmul.f32.gmra.mxu3 %v325_v58 }
  0xdf   : > { %422 = vmatmul.f32.gmra.mxu0 %v310_v59  ;;  %535 = vmatmul.f32.gmra.mxu1 %v310_v59 }
  0xe1   : > { %470 = vmatmul.f32.gmra.mxu2 %v326_v60  ;;  %583 = vmatmul.f32.gmra.mxu3 %v326_v60 }
  0xe7   : > { %425 = vmatmul.f32.gmra.mxu0 %v311_v61  ;;  %538 = vmatmul.f32.gmra.mxu1 %v311_v61 }
  0xe9   : > { %473 = vmatmul.f32.gmra.mxu2 %v327_v62  ;;  %586 = vmatmul.f32.gmra.mxu3 %v327_v62 }
  0xef   : > { %428 = vmatmul.f32.gmra.mxu0 %v312_v63  ;;  %541 = vmatmul.f32.gmra.mxu1 %v312_v63 }
  0xf1   : > { %476 = vmatmul.f32.gmra.mxu2 %v328_v0  ;;  %589 = vmatmul.f32.gmra.mxu3 %v328_v0 }
  0xf4   : > { %v384_v2 = vpop.f32.mrf.mxu0  ;;  %v497_v3 = vpop.f32.mrf.mxu1 }
  0xf5   : > { %v385_v6 = vadd.f32 %v384_v2, %v2034_v4  ;;  %v498_v7 = vadd.f32 %v497_v3, %v2036_v5 }
  0xf7   : > { %v673_v12 = vadd.f32 %v657_v8, %v385_v6  ;;  %v674_v13 = vadd.f32 %v658_v9, %v498_v7 }
  0xf9   : > { %v677_v18 = vsel %vm669_vm0, %v385_v6, %v673_v12  ;;  %v678_v19 = vsel %vm670_vm1, %v498_v7, %v674_v13 }
  0xfa   : > { %vm681_vm2 = vcmp.gt.f32.partialorder %v677_v18, 1.0  ;;  %vm682_vm3 = vcmp.gt.f32.partialorder %v678_v19, 1.0 }
  0xfb   : > { %v1293_v32 = vsel %vm681_vm2, 1.0, %v1743_v31  ;;  %v1294_v35 = vsel %vm682_vm3, 1.0, %v1743_v31 }
  0xfc   : > { %v387_v10 = vpop.f32.mrf.mxu0  ;;  %v500_v11 = vpop.f32.mrf.mxu1  ;;  %v693_v41 = vadd.f32 %v1293_v32, %v661_v30  ;;  %v694_v42 = vadd.f32 %v1294_v35, %v662_v34 }
  0xfd   : > { %v2040_v14 = vpop.f32.mrf.mxu2  ;;  %v2042_v15 = vpop.f32.mrf.mxu3  ;;  %v388_v16 = vadd.f32 %v387_v10, %v2034_v4  ;;  %v501_v17 = vadd.f32 %v500_v11, %v2036_v5 }
  0xff   : > { %v675_v24 = vadd.f32 %v659_v20, %v388_v16  ;;  %v676_v25 = vadd.f32 %v660_v21, %v501_v17 }
 0x101   : > { %v679_v37 = vsel %vm671_vm4, %v388_v16, %v675_v24  ;;  %v680_v38 = vsel %vm672_vm5, %v501_v17, %v676_v25 }
 0x102   : > { %vm683_vm8 = vcmp.gt.f32.partialorder %v679_v37, 1.0  ;;  %vm684_vm9 = vcmp.gt.f32.partialorder %v680_v38, 1.0 }
 0x103   : > { %v1295_v54 = vsel %vm683_vm8, 1.0, %v1743_v31  ;;  %v1296_v57 = vsel %vm684_vm9, 1.0, %v1743_v31 }
 0x104   : > { %v390_v22 = vpop.f32.mrf.mxu0  ;;  %v503_v23 = vpop.f32.mrf.mxu1  ;;  %v695_v61 = vadd.f32 %v1295_v54, %v663_v53  ;;  %v696_v62 = vadd.f32 %v1296_v57, %v664_v56 }
 0x105   : > { %v391_v26 = vadd.f32 %v390_v22, %v2034_v4  ;;  %v504_v27 = vadd.f32 %v503_v23, %v2036_v5  ;;  %v2048_v28 = vpop.f32.mrf.mxu2  ;;  %v2050_v29 = vpop.f32.mrf.mxu3 }
 0x107   : > { %v701_v33 = vadd.f32 %v677_v18, %v391_v26  ;;  %v702_v36 = vadd.f32 %v678_v19, %v504_v27 }
 0x109   : > { %v705_v39 = vsel %vm681_vm2, %v391_v26, %v701_v33  ;;  %v706_v40 = vsel %vm682_vm3, %v504_v27, %v702_v36 }
 0x10a   : > { %vm709_vm6 = vcmp.gt.f32.partialorder %v705_v39, 1.0  ;;  %vm710_vm7 = vcmp.gt.f32.partialorder %v706_v40, 1.0 }
 0x10b   : > { %v1297_v43 = vsel %vm709_vm6, 1.0, %v1743_v31  ;;  %v1298_v44 = vsel %vm710_vm7, 1.0, %v1743_v31 }
 0x10c   : > { %v393_v45 = vpop.f32.mrf.mxu0  ;;  %v506_v46 = vpop.f32.mrf.mxu1  ;;  %v721_v47 = vadd.f32 %v1297_v43, %v693_v41  ;;  %v722_v48 = vadd.f32 %v1298_v44, %v694_v42 }
 0x10d   : > { %v394_v49 = vadd.f32 %v393_v45, %v2034_v4  ;;  %v507_v50 = vadd.f32 %v506_v46, %v2036_v5  ;;  %v2066_v51 = vpop.f32.mrf.mxu2  ;;  %v2068_v52 = vpop.f32.mrf.mxu3 }
 0x10f   : > { %v703_v55 = vadd.f32 %v679_v37, %v394_v49  ;;  %v704_v58 = vadd.f32 %v680_v38, %v507_v50 }
 0x111   : > { %v707_v59 = vsel %vm683_vm8, %v394_v49, %v703_v55  ;;  %v708_v60 = vsel %vm684_vm9, %v507_v50, %v704_v58 }
 0x112   : > { %vm711_vm10 = vcmp.gt.f32.partialorder %v707_v59, 1.0  ;;  %vm712_vm11 = vcmp.gt.f32.partialorder %v708_v60, 1.0 }
 0x113   : > { %v1299_v63 = vsel %vm711_vm10, 1.0, %v1743_v31  ;;  %v1300_v0 = vsel %vm712_vm11, 1.0, %v1743_v31 }
 0x114   : > { %v396_v1 = vpop.f32.mrf.mxu0  ;;  %v509_v2 = vpop.f32.mrf.mxu1  ;;  %v723_v3 = vadd.f32 %v1299_v63, %v695_v61  ;;  %v724_v6 = vadd.f32 %v1300_v0, %v696_v62 }
 0x115   : > { %v397_v7 = vadd.f32 %v396_v1, %v2034_v4  ;;  %v510_v8 = vadd.f32 %v509_v2, %v2036_v5  ;;  %v2080_v9 = vpop.f32.mrf.mxu2  ;;  %v2082_v10 = vpop.f32.mrf.mxu3 }
 0x117   : > { %v729_v11 = vadd.f32 %v705_v39, %v397_v7  ;;  %v730_v12 = vadd.f32 %v706_v40, %v510_v8 }
 0x119   : > { %v733_v13 = vsel %vm709_vm6, %v397_v7, %v729_v11  ;;  %v734_v16 = vsel %vm710_vm7, %v510_v8, %v730_v12 }
 0x11a   : > { %vm737_vm12 = vcmp.gt.f32.partialorder %v733_v13, 1.0  ;;  %vm738_vm13 = vcmp.gt.f32.partialorder %v734_v16, 1.0 }
 0x11b   : > { %v1301_v17 = vsel %vm737_vm12, 1.0, %v1743_v31  ;;  %v1302_v18 = vsel %vm738_vm13, 1.0, %v1743_v31 }
 0x11c   : > { %v399_v19 = vpop.f32.mrf.mxu0  ;;  %v512_v20 = vpop.f32.mrf.mxu1  ;;  %v749_v21 = vadd.f32 %v1301_v17, %v721_v47  ;;  %v750_v22 = vadd.f32 %v1302_v18, %v722_v48 }
 0x11d   : > { %v400_v23 = vadd.f32 %v399_v19, %v2034_v4  ;;  %v513_v24 = vadd.f32 %v512_v20, %v2036_v5  ;;  %v2092_v25 = vpop.f32.mrf.mxu2  ;;  %v2094_v26 = vpop.f32.mrf.mxu3 }
 0x11f   : > { %v731_v27 = vadd.f32 %v707_v59, %v400_v23  ;;  %v732_v30 = vadd.f32 %v708_v60, %v513_v24 }
 0x121   : > { %v735_v32 = vsel %vm711_vm10, %v400_v23, %v731_v27  ;;  %v736_v33 = vsel %vm712_vm11, %v513_v24, %v732_v30 }
 0x122   : > { %vm739_vm14 = vcmp.gt.f32.partialorder %v735_v32, 1.0  ;;  %vm740_vm15 = vcmp.gt.f32.partialorder %v736_v33, 1.0 }
 0x123   : > { %v1303_v34 = vsel %vm739_vm14, 1.0, %v1743_v31  ;;  %v1304_v35 = vsel %vm740_vm15, 1.0, %v1743_v31 }
 0x124   : > { %v402_v36 = vpop.f32.mrf.mxu0  ;;  %v515_v37 = vpop.f32.mrf.mxu1  ;;  %v751_v38 = vadd.f32 %v1303_v34, %v723_v3  ;;  %v752_v39 = vadd.f32 %v1304_v35, %v724_v6 }
 0x125   : > { %v403_v40 = vadd.f32 %v402_v36, %v2034_v4  ;;  %v516_v41 = vadd.f32 %v515_v37, %v2036_v5  ;;  %v2104_v42 = vpop.f32.mrf.mxu2  ;;  %v2106_v43 = vpop.f32.mrf.mxu3 }
 0x127   : > { %v757_v44 = vadd.f32 %v733_v13, %v403_v40  ;;  %v758_v45 = vadd.f32 %v734_v16, %v516_v41 }
 0x129   : > { %v761_v46 = vsel %vm737_vm12, %v403_v40, %v757_v44  ;;  %v762_v47 = vsel %vm738_vm13, %v516_v41, %v758_v45 }
 0x12a   : > { %vm765_vm0 = vcmp.gt.f32.partialorder %v761_v46, 1.0  ;;  %vm766_vm1 = vcmp.gt.f32.partialorder %v762_v47, 1.0 }
 0x12b   : > { %v1305_v48 = vsel %vm765_vm0, 1.0, %v1743_v31  ;;  %v1306_v49 = vsel %vm766_vm1, 1.0, %v1743_v31 }
 0x12c   : > { %v405_v50 = vpop.f32.mrf.mxu0  ;;  %v518_v53 = vpop.f32.mrf.mxu1  ;;  %v777_v54 = vadd.f32 %v1305_v48, %v749_v21  ;;  %v778_v55 = vadd.f32 %v1306_v49, %v750_v22 }
 0x12d   : > { %v406_v56 = vadd.f32 %v405_v50, %v2034_v4  ;;  %v519_v57 = vadd.f32 %v518_v53, %v2036_v5  ;;  %v2116_v58 = vpop.f32.mrf.mxu2  ;;  %v2118_v59 = vpop.f32.mrf.mxu3 }
 0x12f   : > { %v759_v60 = vadd.f32 %v735_v32, %v406_v56  ;;  %v760_v61 = vadd.f32 %v736_v33, %v519_v57 }
 0x131   : > { %v763_v62 = vsel %vm739_vm14, %v406_v56, %v759_v60  ;;  %v764_v63 = vsel %vm740_vm15, %v519_v57, %v760_v61 }
 0x132   : > { %vm767_vm2 = vcmp.gt.f32.partialorder %v763_v62, 1.0  ;;  %vm768_vm3 = vcmp.gt.f32.partialorder %v764_v63, 1.0 }
 0x133   : > { %v1307_v0 = vsel %vm767_vm2, 1.0, %v1743_v31  ;;  %v1308_v1 = vsel %vm768_vm3, 1.0, %v1743_v31 }
 0x134   : > { %v408_v2 = vpop.f32.mrf.mxu0  ;;  %v521_v3 = vpop.f32.mrf.mxu1  ;;  %v779_v6 = vadd.f32 %v1307_v0, %v751_v38  ;;  %v780_v7 = vadd.f32 %v1308_v1, %v752_v39 }
 0x135   : > { %v409_v8 = vadd.f32 %v408_v2, %v2034_v4  ;;  %v522_v11 = vadd.f32 %v521_v3, %v2036_v5  ;;  %v2128_v12 = vpop.f32.mrf.mxu2  ;;  %v2130_v13 = vpop.f32.mrf.mxu3 }
 0x137   : > { %v785_v16 = vadd.f32 %v761_v46, %v409_v8  ;;  %v786_v17 = vadd.f32 %v762_v47, %v522_v11 }
 0x139   : > { %v789_v18 = vsel %vm765_vm0, %v409_v8, %v785_v16  ;;  %v790_v19 = vsel %vm766_vm1, %v522_v11, %v786_v17 }
 0x13a   : > { %vm793_vm4 = vcmp.gt.f32.partialorder %v789_v18, 1.0  ;;  %vm794_vm5 = vcmp.gt.f32.partialorder %v790_v19, 1.0 }
 0x13b   : > { %v1309_v20 = vsel %vm793_vm4, 1.0, %v1743_v31  ;;  %v1310_v21 = vsel %vm794_vm5, 1.0, %v1743_v31 }
 0x13c   : > { %v411_v22 = vpop.f32.mrf.mxu0  ;;  %v524_v23 = vpop.f32.mrf.mxu1  ;;  %v805_v24 = vadd.f32 %v1309_v20, %v777_v54  ;;  %v806_v27 = vadd.f32 %v1310_v21, %v778_v55 }
 0x13d   : > { %v412_v30 = vadd.f32 %v411_v22, %v2034_v4  ;;  %v525_v32 = vadd.f32 %v524_v23, %v2036_v5  ;;  %v2140_v33 = vpop.f32.mrf.mxu2  ;;  %v2142_v34 = vpop.f32.mrf.mxu3 }
 0x13f   : > { %v787_v35 = vadd.f32 %v763_v62, %v412_v30  ;;  %v788_v36 = vadd.f32 %v764_v63, %v525_v32 }
 0x141   : > { %v791_v37 = vsel %vm767_vm2, %v412_v30, %v787_v35  ;;  %v792_v38 = vsel %vm768_vm3, %v525_v32, %v788_v36 }
 0x142   : > { %vm795_vm6 = vcmp.gt.f32.partialorder %v791_v37, 1.0  ;;  %vm796_vm7 = vcmp.gt.f32.partialorder %v792_v38, 1.0 }
 0x143   : > { %v1311_v39 = vsel %vm795_vm6, 1.0, %v1743_v31  ;;  %v1312_v40 = vsel %vm796_vm7, 1.0, %v1743_v31 }
 0x144   : > { %v414_v41 = vpop.f32.mrf.mxu0  ;;  %v527_v44 = vpop.f32.mrf.mxu1  ;;  %v807_v45 = vadd.f32 %v1311_v39, %v779_v6  ;;  %v808_v46 = vadd.f32 %v1312_v40, %v780_v7 }
 0x145   : > { %v415_v47 = vadd.f32 %v414_v41, %v2034_v4  ;;  %v528_v48 = vadd.f32 %v527_v44, %v2036_v5  ;;  %v2152_v49 = vpop.f32.mrf.mxu2  ;;  %v2154_v50 = vpop.f32.mrf.mxu3 }
 0x147   : > { %v813_v53 = vadd.f32 %v789_v18, %v415_v47  ;;  %v814_v54 = vadd.f32 %v790_v19, %v528_v48 }
 0x149   : > { %v817_v55 = vsel %vm793_vm4, %v415_v47, %v813_v53  ;;  %v818_v56 = vsel %vm794_vm5, %v528_v48, %v814_v54 }
 0x14a   : > { %vm821_vm8 = vcmp.gt.f32.partialorder %v817_v55, 1.0  ;;  %vm822_vm9 = vcmp.gt.f32.partialorder %v818_v56, 1.0 }
 0x14b   : > { %v1313_v57 = vsel %vm821_vm8, 1.0, %v1743_v31  ;;  %v1314_v60 = vsel %vm822_vm9, 1.0, %v1743_v31 }
 0x14c   : > { %v417_v61 = vpop.f32.mrf.mxu0  ;;  %v530_v62 = vpop.f32.mrf.mxu1  ;;  %v833_v63 = vadd.f32 %v1313_v57, %v805_v24  ;;  %v834_v0 = vadd.f32 %v1314_v60, %v806_v27  ;;  %v546_v57 = vadd.f32 %v2042_v15, %v2036_v5  ;;  %v2190_v60 = vadd.f32 %v2048_v28, %v2034_v4 }
 0x14d   : > { %v418_v1 = vadd.f32 %v417_v61, %v2034_v4  ;;  %v531_v2 = vadd.f32 %v530_v62, %v2036_v5  ;;  %v2164_v3 = vpop.f32.mrf.mxu2  ;;  %v2166_v6 = vpop.f32.mrf.mxu3  ;;  %v2194_v61 = vadd.f32 %v2050_v29, %v2036_v5  ;;  %v2198_v62 = vadd.f32 %v2066_v51, %v2034_v4 }
 0x14e   : > { %v2212_v28 = vadd.f32 %v2080_v9, %v2034_v4  ;;  %v2216_v29 = vadd.f32 %v2082_v10, %v2036_v5  ;;  %v2222_v51 = vadd.f32 %v2092_v25, %v2034_v4  ;;  %v2240_v25 = vadd.f32 %v2106_v43, %v2036_v5 }
 0x14f   : > { %v815_v7 = vadd.f32 %v791_v37, %v418_v1  ;;  %v816_v8 = vadd.f32 %v792_v38, %v531_v2  ;;  %v2258_v43 = vadd.f32 %v2128_v12, %v2034_v4  ;;  %v2278_v12 = vadd.f32 %v2154_v50, %v2036_v5 }
 0x151   : > { %v819_v11 = vsel %vm795_vm6, %v418_v1, %v815_v7  ;;  %v820_v16 = vsel %vm796_vm7, %v531_v2, %v816_v8  ;;  %v2248_v8 = vadd.f32 %v2116_v58, %v2034_v4  ;;  %v2266_v58 = vadd.f32 %v2140_v33, %v2034_v4 }
 0x152   : > { %vm823_vm10 = vcmp.gt.f32.partialorder %v819_v11, 1.0  ;;  %vm824_vm11 = vcmp.gt.f32.partialorder %v820_v16, 1.0  ;;  %v2286_v33 = vadd.f32 %v2166_v6, %v2036_v5 }
 0x153   : > { %v1315_v17 = vsel %vm823_vm10, 1.0, %v1743_v31  ;;  %v1316_v18 = vsel %vm824_vm11, 1.0, %v1743_v31 }
 0x154   : > { %v420_v19 = vpop.f32.mrf.mxu0  ;;  %v533_v20 = vpop.f32.mrf.mxu1  ;;  %v835_v21 = vadd.f32 %v1315_v17, %v807_v45  ;;  %v836_v22 = vadd.f32 %v1316_v18, %v808_v46  ;;  %v2262_v17 = vadd.f32 %v2130_v13, %v2036_v5  ;;  %v2274_v18 = vadd.f32 %v2152_v49, %v2034_v4 }
 0x155   : > { %v421_v23 = vadd.f32 %v420_v19, %v2034_v4  ;;  %v534_v24 = vadd.f32 %v533_v20, %v2036_v5  ;;  %v465_v27 = vpop.f32.mrf.mxu2  ;;  %v578_v30 = vpop.f32.mrf.mxu3  ;;  %v2282_v13 = vadd.f32 %v2164_v3, %v2034_v4 }
 0x156   : > { %v2292_v49 = vadd.f32 %v578_v30, %v2036_v5 }
 0x157   : > { %v841_v32 = vadd.f32 %v817_v55, %v421_v23  ;;  %v842_v35 = vadd.f32 %v818_v56, %v534_v24  ;;  %v433_v56 = vadd.f32 %v2040_v14, %v2034_v4 }
 0x159   : > { %v845_v36 = vsel %vm821_vm8, %v421_v23, %v841_v32  ;;  %v846_v37 = vsel %vm822_vm9, %v534_v24, %v842_v35 }
 0x15a   : > { %vm849_vm12 = vcmp.gt.f32.partialorder %v845_v36, 1.0  ;;  %vm850_vm13 = vcmp.gt.f32.partialorder %v846_v37, 1.0 }
 0x15b   : > { %v1317_v38 = vsel %vm849_vm12, 1.0, %v1743_v31  ;;  %v1318_v39 = vsel %vm850_vm13, 1.0, %v1743_v31 }
 0x15c   : > { %v423_v40 = vpop.f32.mrf.mxu0  ;;  %v536_v41 = vpop.f32.mrf.mxu1  ;;  %v861_v44 = vadd.f32 %v1317_v38, %v833_v63  ;;  %v862_v45 = vadd.f32 %v1318_v39, %v834_v0  ;;  %v2202_v63 = vadd.f32 %v2068_v52, %v2036_v5  ;;  %v2226_v52 = vadd.f32 %v2094_v26, %v2036_v5 }
 0x15d   : > { %v424_v46 = vadd.f32 %v423_v40, %v2034_v4  ;;  %v537_v47 = vadd.f32 %v536_v41, %v2036_v5  ;;  %v468_v48 = vpop.f32.mrf.mxu2  ;;  %v581_v53 = vpop.f32.mrf.mxu3  ;;  %v2236_v0 = vadd.f32 %v2104_v42, %v2034_v4 }
 0x15e   : > { %v2297_v24 = vadd.f32 %v468_v48, %v2034_v4  ;;  %v2300_v3 = vadd.f32 %v581_v53, %v2036_v5 }
 0x15f   : > { %v843_v54 = vadd.f32 %v819_v11, %v424_v46  ;;  %v844_v55 = vadd.f32 %v820_v16, %v537_v47  ;;  %v2252_v11 = vadd.f32 %v2118_v59, %v2036_v5  ;;  %v2270_v59 = vadd.f32 %v2142_v34, %v2036_v5 }
 0x160   : > { %v2289_v34 = vadd.f32 %v465_v27, %v2034_v4 }
 0x161   : > { %v2205_v14 = vsel %vm823_vm10, %v424_v46, %v843_v54  ;;  %v2208_v15 = vsel %vm824_vm11, %v537_v47, %v844_v55 }
 0x162   : > { %vm851_vm14 = vcmp.gt.f32.partialorder %v2205_v14, 1.0  ;;  %vm852_vm15 = vcmp.gt.f32.partialorder %v2208_v15, 1.0 }
 0x163   : > { %v1319_v9 = vsel %vm851_vm14, 1.0, %v1743_v31  ;;  %v1320_v10 = vsel %vm852_vm15, 1.0, %v1743_v31 }
 0x164   : > { %v426_v1 = vpop.f32.mrf.mxu0  ;;  %v539_v2 = vpop.f32.mrf.mxu1  ;;  %v2242_v26 = vadd.f32 %v1319_v9, %v835_v21  ;;  %v2244_v7 = vadd.f32 %v1320_v10, %v836_v22 }
 0x165   : > { %v427_v42 = vadd.f32 %v426_v1, %v2034_v4  ;;  %v540_v16 = vadd.f32 %v539_v2, %v2036_v5  ;;  %v471_v21 = vpop.f32.mrf.mxu2  ;;  %v584_v22 = vpop.f32.mrf.mxu3 }
 0x166   : > { %v2305_v35 = vadd.f32 %v471_v21, %v2034_v4 }
 0x167   : > { %v869_v19 = vadd.f32 %v845_v36, %v427_v42  ;;  %v870_v20 = vadd.f32 %v846_v37, %v540_v16  ;;  %v2308_v36 = vadd.f32 %v584_v22, %v2036_v5 }
 0x169   : > { %v873_v50 = vsel %vm849_vm12, %v427_v42, %v869_v19  ;;  %v874_v23 = vsel %vm850_vm13, %v540_v16, %v870_v20 }
 0x16a   : > { %vm877_vm0 = vcmp.gt.f32.partialorder %v873_v50, 1.0  ;;  %v897_v6 = vadd.f32 %v873_v50, %v433_v56  ;;  %vm878_vm1 = vcmp.gt.f32.partialorder %v874_v23, 1.0  ;;  %v898_v27 = vadd.f32 %v874_v23, %v546_v57 }
 0x16b   : > { %v1321_v32 = vsel %vm877_vm0, 1.0, %v1743_v31  ;;  %v1322_v30 = vsel %vm878_vm1, 1.0, %v1743_v31 }
 0x16c   : > { %v889_v37 = vadd.f32 %v1321_v32, %v861_v44  ;;  %v901_v38 = vsel %vm877_vm0, %v433_v56, %v897_v6  ;;  %v890_v39 = vadd.f32 %v1322_v30, %v862_v45  ;;  %v902_v40 = vsel %vm878_vm1, %v546_v57, %v898_v27  ;;  %v429_v41 = vpop.f32.mrf.mxu0  ;;  %v542_v46 = vpop.f32.mrf.mxu1 }
 0x16d   : > { %vm905_vm2 = vcmp.gt.f32.partialorder %v901_v38, 1.0  ;;  %v925_v47 = vadd.f32 %v901_v38, %v2198_v62  ;;  %vm906_vm3 = vcmp.gt.f32.partialorder %v902_v40, 1.0  ;;  %v926_v48 = vadd.f32 %v902_v40, %v2202_v63 }
 0x16e   : > { %v1325_v53 = vsel %vm905_vm2, 1.0, %v1743_v31  ;;  %v1326_v54 = vsel %vm906_vm3, 1.0, %v1743_v31  ;;  %v430_v55 = vadd.f32 %v429_v41, %v2034_v4  ;;  %v543_v9 = vadd.f32 %v542_v46, %v2036_v5 }
 0x16f   : > { %v917_v44 = vadd.f32 %v1325_v53, %v889_v37  ;;  %v929_v45 = vsel %vm905_vm2, %v2198_v62, %v925_v47  ;;  %v918_v56 = vadd.f32 %v1326_v54, %v890_v39  ;;  %v930_v57 = vsel %vm906_vm3, %v2202_v63, %v926_v48 }
 0x170   : > { %vm933_vm4 = vcmp.gt.f32.partialorder %v929_v45, 1.0  ;;  %v953_v10 = vadd.f32 %v929_v45, %v2222_v51  ;;  %vm934_vm5 = vcmp.gt.f32.partialorder %v930_v57, 1.0  ;;  %v954_v1 = vadd.f32 %v930_v57, %v2226_v52 }
 0x171   : > { %v1329_v2 = vsel %vm933_vm4, 1.0, %v1743_v31  ;;  %v1330_v42 = vsel %vm934_vm5, 1.0, %v1743_v31  ;;  %v871_v16 = vadd.f32 %v2205_v14, %v430_v55  ;;  %v872_v19 = vadd.f32 %v2208_v15, %v543_v9 }
 0x172   : > { %v945_v20 = vadd.f32 %v1329_v2, %v917_v44  ;;  %v946_v21 = vadd.f32 %v1330_v42, %v918_v56  ;;  %v957_v62 = vsel %vm933_vm4, %v2222_v51, %v953_v10  ;;  %v958_v63 = vsel %vm934_vm5, %v2226_v52, %v954_v1 }
 0x173   : > { %v875_v22 = vsel %vm851_vm14, %v430_v55, %v871_v16  ;;  %vm961_vm6 = vcmp.gt.f32.partialorder %v957_v62, 1.0  ;;  %v981_v50 = vadd.f32 %v957_v62, %v2248_v8  ;;  %v876_v23 = vsel %vm852_vm15, %v543_v9, %v872_v19 }
 0x174   : > { %vm879_vm7 = vcmp.gt.f32.partialorder %v875_v22, 1.0  ;;  %v899_v6 = vadd.f32 %v875_v22, %v2190_v60  ;;  %v1333_v27 = vsel %vm961_vm6, 1.0, %v1743_v31  ;;  %vm880_vm8 = vcmp.gt.f32.partialorder %v876_v23, 1.0 }
 0x175   : > { %v1323_v32 = vsel %vm879_vm7, 1.0, %v1743_v31  ;;  %v973_v51 = vadd.f32 %v1333_v27, %v945_v20  ;;  %v985_v52 = vsel %vm961_vm6, %v2248_v8, %v981_v50  ;;  %v1324_v14 = vsel %vm880_vm8, 1.0, %v1743_v31 }
 0x176   : > { %v891_v30 = vadd.f32 %v1323_v32, %v2242_v26  ;;  %v903_v37 = vsel %vm879_vm7, %v2190_v60, %v899_v6  ;;  %vm989_vm9 = vcmp.gt.f32.partialorder %v985_v52, 1.0  ;;  %v1009_v15 = vadd.f32 %v985_v52, %v2266_v58 }
 0x177   : > { %vm907_vm10 = vcmp.gt.f32.partialorder %v903_v37, 1.0  ;;  %v927_v38 = vadd.f32 %v903_v37, %v2212_v28  ;;  %v1337_v39 = vsel %vm989_vm9, 1.0, %v1743_v31  ;;  %v892_v40 = vadd.f32 %v1324_v14, %v2244_v7  ;;  %v474_v37 = vpop.f32.mrf.mxu2 }
 0x178   : > { %v1327_v41 = vsel %vm907_vm10, 1.0, %v1743_v31  ;;  %v1001_v8 = vadd.f32 %v1337_v39, %v973_v51  ;;  %v1013_v46 = vsel %vm989_vm9, %v2266_v58, %v1009_v15  ;;  %v900_v47 = vadd.f32 %v876_v23, %v2194_v61 }
 0x179   : > { %v919_v26 = vadd.f32 %v1327_v41, %v891_v30  ;;  %v931_v60 = vsel %vm907_vm10, %v2212_v28, %v927_v38  ;;  %vm1017_vm11 = vcmp.gt.f32.partialorder %v1013_v46, 1.0  ;;  %v1037_v48 = vadd.f32 %v1013_v46, %v2282_v13 }
 0x17a   : > { %vm935_vm12 = vcmp.gt.f32.partialorder %v931_v60, 1.0  ;;  %v955_v53 = vadd.f32 %v931_v60, %v2236_v0  ;;  %v1341_v54 = vsel %vm1017_vm11, 1.0, %v1743_v31  ;;  %v904_v7 = vsel %vm880_vm8, %v2194_v61, %v900_v47 }
 0x17b   : > { %v1331_v55 = vsel %vm935_vm12, 1.0, %v1743_v31  ;;  %v1029_v58 = vadd.f32 %v1341_v54, %v1001_v8  ;;  %v2355_v9 = vsel %vm1017_vm11, %v2282_v13, %v1037_v48  ;;  %vm908_vm13 = vcmp.gt.f32.partialorder %v904_v7, 1.0  ;;  %v587_v8 = vpop.f32.mrf.mxu3 }
 0x17c   : > { %v947_v28 = vadd.f32 %v1331_v55, %v919_v26  ;;  %vm1045_vm14 = vcmp.gt.f32.partialorder %v2355_v9, 1.0  ;;  %v1065_v44 = vadd.f32 %v2355_v9, %v2297_v24  ;;  %v1328_v45 = vsel %vm908_vm13, 1.0, %v1743_v31 }
 0x17d   : > { %v1345_v61 = vsel %vm1045_vm14, 1.0, %v1743_v31  ;;  %v920_v56 = vadd.f32 %v1328_v45, %v892_v40  ;;  %v928_v57 = vadd.f32 %v904_v7, %v2216_v29  ;;  %vm962_vm15 = vcmp.gt.f32.partialorder %v958_v63, 1.0 }
 0x17e   : > { %v2365_v10 = vadd.f32 %v1345_v61, %v1029_v58  ;;  %v1334_v13 = vsel %vm962_vm15, 1.0, %v1743_v31  ;;  %v982_v1 = vadd.f32 %v958_v63, %v2252_v11  ;;  %v959_v2 = vsel %vm935_vm12, %v2236_v0, %v955_v53 }
 0x17f   : > { %v932_v42 = vsel %vm908_vm13, %v2216_v29, %v928_v57  ;;  %v974_v16 = vadd.f32 %v1334_v13, %v946_v21  ;;  %vm963_vm0 = vcmp.gt.f32.partialorder %v959_v2, 1.0  ;;  %v983_v19 = vadd.f32 %v959_v2, %v2258_v43 }
 0x180   : > { %vm936_vm1 = vcmp.gt.f32.partialorder %v932_v42, 1.0  ;;  %v956_v20 = vadd.f32 %v932_v42, %v2240_v25  ;;  %v986_v62 = vsel %vm962_vm15, %v2252_v11, %v982_v1  ;;  %v1335_v22 = vsel %vm963_vm0, 1.0, %v1743_v31 }
 0x181   : > { %v1332_v50 = vsel %vm936_vm1, 1.0, %v1743_v31  ;;  %vm990_vm2 = vcmp.gt.f32.partialorder %v986_v62, 1.0  ;;  %v1010_v63 = vadd.f32 %v986_v62, %v2270_v59  ;;  %v975_v0 = vadd.f32 %v1335_v22, %v947_v28 }
 0x182   : > { %v948_v23 = vadd.f32 %v1332_v50, %v920_v56  ;;  %v1338_v29 = vsel %vm990_vm2, 1.0, %v1743_v31  ;;  %v987_v21 = vsel %vm963_vm0, %v2258_v43, %v983_v19  ;;  %v960_v6 = vsel %vm936_vm1, %v2240_v25, %v956_v20 }
 0x183   : > { %v1002_v27 = vadd.f32 %v1338_v29, %v974_v16  ;;  %v1014_v32 = vsel %vm990_vm2, %v2270_v59, %v1010_v63  ;;  %vm991_vm3 = vcmp.gt.f32.partialorder %v987_v21, 1.0  ;;  %v1011_v11 = vadd.f32 %v987_v21, %v2274_v18  ;;  %v477_v16 = vpop.f32.mrf.mxu2  ;;  %v590_v50 = vpop.f32.mrf.mxu3 }
 0x184   : > { %vm1018_vm4 = vcmp.gt.f32.partialorder %v1014_v32, 1.0  ;;  %v1038_v51 = vadd.f32 %v1014_v32, %v2286_v33  ;;  %v1339_v52 = vsel %vm991_vm3, 1.0, %v1743_v31  ;;  %vm964_vm5 = vcmp.gt.f32.partialorder %v960_v6, 1.0 }
 0x185   : > { %v1342_v14 = vsel %vm1018_vm4, 1.0, %v1743_v31  ;;  %v1003_v30 = vadd.f32 %v1339_v52, %v975_v0  ;;  %v1015_v43 = vsel %vm991_vm3, %v2274_v18, %v1011_v11  ;;  %v1336_v25 = vsel %vm964_vm5, 1.0, %v1743_v31 }
 0x186   : > { %v1030_v59 = vadd.f32 %v1342_v14, %v1002_v27  ;;  %v1042_v15 = vsel %vm1018_vm4, %v2286_v33, %v1038_v51  ;;  %vm1019_vm6 = vcmp.gt.f32.partialorder %v1015_v43, 1.0  ;;  %v1039_v38 = vadd.f32 %v1015_v43, %v2289_v34 }
 0x187   : > { %vm1046_vm7 = vcmp.gt.f32.partialorder %v1042_v15, 1.0  ;;  %v1066_v39 = vadd.f32 %v1042_v15, %v2300_v3  ;;  %v1343_v40 = vsel %vm1019_vm6, 1.0, %v1743_v31  ;;  %v976_v41 = vadd.f32 %v1336_v25, %v948_v23 }
 0x188   : > { %v1346_v18 = vsel %vm1046_vm7, 1.0, %v1743_v31  ;;  %v1031_v46 = vadd.f32 %v1343_v40, %v1003_v30  ;;  %v1043_v47 = vsel %vm1019_vm6, %v2289_v34, %v1039_v38  ;;  %v984_v33 = vadd.f32 %v960_v6, %v2262_v17 }
 0x189   : > { %v1058_v26 = vadd.f32 %v1346_v18, %v1030_v59  ;;  %vm1047_vm8 = vcmp.gt.f32.partialorder %v1043_v47, 1.0  ;;  %v1067_v60 = vadd.f32 %v1043_v47, %v2305_v35  ;;  %v475_v48 = vadd.f32 %v474_v37, %v2034_v4 }
 0x18a   : > { %v1347_v53 = vsel %vm1047_vm8, 1.0, %v1743_v31  ;;  %v988_v54 = vsel %vm964_vm5, %v2262_v17, %v984_v33  ;;  %v1069_v7 = vsel %vm1045_vm14, %v2297_v24, %v1065_v44  ;;  %v2409_v55 = vstv %s1122_s23 }
 0x18b   : > { %v1059_v34 = vadd.f32 %v1347_v53, %v1031_v46  ;;  %vm992_vm9 = vcmp.gt.f32.partialorder %v988_v54, 1.0  ;;  %v1012_v58 = vadd.f32 %v988_v54, %v2278_v12  ;;  %vm1073_vm10 = vcmp.gt.f32.partialorder %v1069_v7, 1.0 }
 0x18c   : > { %v1340_v28 = vsel %vm992_vm9, 1.0, %v1743_v31  ;;  %v1349_v45 = vsel %vm1073_vm10, 1.0, %v1743_v31  ;;  %v1093_v61 = vadd.f32 %v1069_v7, %v475_v48  ;;  %v588_v56 = vadd.f32 %v587_v8, %v2036_v5 }
 0x18d   : > { %v1004_v57 = vadd.f32 %v1340_v28, %v976_v41  ;;  %v1016_v17 = vsel %vm992_vm9, %v2278_v12, %v1012_v58  ;;  %v1085_v9 = vadd.f32 %v1349_v45, %v2365_v10  ;;  %v1070_v24 = vsel %vm1046_vm7, %v2300_v3, %v1066_v39 }
 0x18e   : > { %vm1020_vm11 = vcmp.gt.f32.partialorder %v1016_v17, 1.0  ;;  %v1040_v44 = vadd.f32 %v1016_v17, %v2292_v49  ;;  %v1097_v13 = vsel %vm1073_vm10, %v475_v48, %v1093_v61  ;;  %vm1074_vm12 = vcmp.gt.f32.partialorder %v1070_v24, 1.0 }
 0x18f   : > { %v1344_v1 = vsel %vm1020_vm11, 1.0, %v1743_v31  ;;  %vm1101_vm13 = vcmp.gt.f32.partialorder %v1097_v13, 1.0  ;;  %1117 = vst [vmem:[#allocation2 + $0x10] sm:$0xff] %v1097_v13  ;;  %v1350_v2 = vsel %vm1074_vm12, 1.0, %v1743_v31  ;;  %v1094_v42 = vadd.f32 %v1070_v24, %v588_v56 }
 0x190   : > { %v1032_v19 = vadd.f32 %v1344_v1, %v1004_v57  ;;  %v1044_v12 = vsel %vm1020_vm11, %v2292_v49, %v1040_v44  ;;  %v1353_v10 = vsel %vm1101_vm13, 1.0, %v1743_v31  ;;  %v1086_v3 = vadd.f32 %v1350_v2, %v1058_v26 }
 0x191   : > { %vm1048_vm14 = vcmp.gt.f32.partialorder %v1044_v12, 1.0  ;;  %v1068_v20 = vadd.f32 %v1044_v12, %v2308_v36  ;;  %v1113_v62 = vadd.f32 %v1353_v10, %v1085_v9  ;;  %v1098_v22 = vsel %vm1074_vm12, %v588_v56, %v1094_v42 }
 0x192   : > { %v1348_v63 = vsel %vm1048_vm14, 1.0, %v1743_v31  ;;  %vm1102_vm15 = vcmp.gt.f32.partialorder %v1098_v22, 1.0  ;;  %1118 = vst [vmem:[#allocation2] sm:$0xff] %v1098_v22  ;;  %v478_v0 = vadd.f32 %v477_v16, %v2034_v4  ;;  %v1071_v49 = vsel %vm1047_vm8, %v2305_v35, %v1067_v60 }
 0x193   : > { %v1060_v23 = vadd.f32 %v1348_v63, %v1032_v19  ;;  %v1124_v29 = vmul.f32 %v2409_v55, %v1113_v62  ;;  %v1354_v21 = vsel %vm1102_vm15, 1.0, %v1743_v31  ;;  %vm1075_vm0 = vcmp.gt.f32.partialorder %v1071_v49, 1.0 }
 0x194   : > { %v1114_v6 = vadd.f32 %v1354_v21, %v1086_v3  ;;  %v1351_v27 = vsel %vm1075_vm0, 1.0, %v1743_v31  ;;  %v1095_v32 = vadd.f32 %v1071_v49, %v478_v0  ;;  %v591_v11 = vadd.f32 %v590_v50, %v2036_v5 }
 0x195   : > { %1128 = vst [vmem:[%s1962_s6] sm:$0xff] %v1124_v29  ;;  %v1087_v4 = vadd.f32 %v1351_v27, %v1059_v34  ;;  %v1072_v35 = vsel %vm1048_vm14, %v2308_v36, %v1068_v20 }
 0x196   : > { %v1125_v51 = vmul.f32 %v2409_v55, %v1114_v6  ;;  %v1099_v52 = vsel %vm1075_vm0, %v478_v0, %v1095_v32  ;;  %vm1076_vm1 = vcmp.gt.f32.partialorder %v1072_v35, 1.0  ;;  %v1096_v14 = vadd.f32 %v1072_v35, %v591_v11 }
 0x197   : > { %vm1103_vm2 = vcmp.gt.f32.partialorder %v1099_v52, 1.0  ;;  %1119 = vst [vmem:[#allocation2 + $0x18] sm:$0xff] %v1099_v52  ;;  %v1352_v5 = vsel %vm1076_vm1, 1.0, %v1743_v31 }
 0x198   : > { %1129 = vst [vmem:[%s1962_s6 + $0x8] sm:$0xff] %v1125_v51  ;;  %v1355_v30 = vsel %vm1103_vm2, 1.0, %v1743_v31  ;;  %v1088_v36 = vadd.f32 %v1352_v5, %v1060_v23  ;;  %v1100_v43 = vsel %vm1076_vm1, %v591_v11, %v1096_v14 }
 0x199   : > { %v1115_v25 = vadd.f32 %v1355_v30, %v1087_v4  ;;  %vm1104_vm3 = vcmp.gt.f32.partialorder %v1100_v43, 1.0  ;;  %1120 = vst [vmem:[#allocation2 + $0x8] sm:$0xff] %v1100_v43 }
 0x19a   : > { %v1356_v37 = vsel %vm1104_vm3, 1.0, %v1743_v31 }
 0x19b   : > { %v1126_v59 = vmul.f32 %v2409_v55, %v1115_v25  ;;  %v1116_v15 = vadd.f32 %v1356_v37, %v1088_v36 }
 0x19d   : > { %1130 = vst [vmem:[%s1962_s6 + $0x10] sm:$0xff] %v1126_v59  ;;  %v1127_v38 = vmul.f32 %v2409_v55, %v1116_v15 }
 0x19f   : > { %1131 = vst [vmem:[%s1962_s6 + $0x18] sm:$0xff] %v1127_v38 }
 0x1a0   : > { %1636 = shalt.err (!%p1633_p0)
}
 0x1a1   : > { %s1744_s19 = smov 256   ;;  %s1745_s24 = smov 512  }
 0x1a2   : > { %s1746_s5 = smov 16  }
 0x1a3   : > { %1403 = dma.vmem_to_hbm [thread:$0]  (%p1839_p6), %s1146_s8, 512, %s1148_s15, %s1133_s9, %s1744_s19, %s1745_s24, %s1746_s5  }
 0x1a4 PF: > { %s2540_s26 = sld [smem:[#allocation14_spill]]  ;;  %p1420_p13 = scmp.ge.s32.totalorder %s1735_s22, 2 }
 0x1a6   : > { %p1416_p2 = pnand %p1420_p13, %p1846_p7 }
 0x1a8   : > { %p1417_p1 = pneg %p1416_p2 }
 0x1aa   : > { %s1162_s6 = sand.u32 1, %s2540_s26  }
 0x1ab   : > { %s1163_s23 = scalar_lea.sflag [#allocation6], %s1162_s6 }
 0x1ac   : > { %1690 = dma.done.wait (%p1417_p1), %s1163_s23, 512  }
 0x1ad   : > { %1692 = vsyncadd (%p1417_p1), %s1163_s23, 4294966784  ;;  %s22_s22 = sadd.s32 1, %s1735_s22   ;;  %s2542_s18 = sld [smem:[#allocation23_spill]] }
 0x1ae   : > { %p19_p8 = scmp.ge.s32.totalorder %s22_s22, 6   ;;  %s2543_s30 = sld [smem:[#allocation15_spill]] }
 0x1af   : > { %s2544_s17 = sld [smem:[#allocation22_spill]]  ;;  %s2548_s12 = smov %s1699_s13 }
 0x1b0   : > { %s2545_s29 = sld [smem:[#allocation17_spill]]  ;;  %s2549_s13 = smov %s1703_s14 }
 0x1b1   : > { %s2546_s20 = sld [smem:[#allocation20_spill]]  ;;  %s2551_s15 = smov %s1711_s16 }
 0x1b2   : > { %s2547_s7 = sld [smem:[#allocation21_spill]]  ;;  %s2554_s19 = smov %s1731_s21 }
 0x1b3   : > { %s2550_s14 = smov %s2542_s18 }
 0x1b4   : > { %s2552_s16 = smov %s2543_s30  ;;  %21 = sbr.rel (!%p19_p8) target bundleno = 14 (0xe), region = 105 }
 0x1b6   : > { %s2553_s18 = smov %s2545_s29 }
 0x1b8   : > { %s2555_s21 = smov %s2547_s7 }
 0x1b9   :  { %1169 = vsyncpa [#allocation5], 1 }
 0x1ba   :  { %1171 = vsyncpa [#allocation5 + $0x1], 1 }
 0x1bb   :  { %1172 = vsyncpa [#allocation8], 1 }
 0x1bc   :  { %1174 = vsyncpa [#allocation8 + $0x1], 1 }
 0x1bd   :  { %1175 = vsyncpa [#allocation6], 1 }
 0x1be   :  { %1177 = vsyncpa [#allocation6 + $0x1], 1 }

</bundles_post_ra>
